<compile_context>
chip_gen: v7x
topology: tpu7x:2x2x1
jax: 0.10.0
libtpu: 0.0.40
codegen_flags: <defaults>
</compile_context>

<pallas_src>
import numpy as np
import jax
import jax.numpy as jnp
from jax.experimental import pallas as pl
from jax.experimental.pallas import tpu as pltpu

# Small, module-consistent shapes (module: input_size=14, output_size=1, 2 layers)
SEQ, TOTAL_BATCH, INPUT, HIDDEN, LAYERS, OUTPUT = 8, 16, 14, 32, 2, 1
GROUPS = 2          # grid axis over independent sequence groups (8 seqs each)


# ---------------------------------------------------------------------------
# Fully fused kernel: both LSTM layers (wavefront-interleaved) + ReLU + FC.
# One grid step == one group of `batch` independent sequences.
# ---------------------------------------------------------------------------
def fused_lstm_kernel(x_ref, wih1_ref, whh1_ref, wih2_ref, whh2_ref, b2_ref,
                      h0_ref, c0_ref, wfc_ref, bfc_ref, out_ref):
    n = x_ref.shape[0]                 # seq * batch
    hdim = whh1_ref.shape[0]           # HIDDEN
    batch = h0_ref.shape[1]
    seq = n // batch

    # ---- hoisted constants: single-tanh gate activation --------------------
    # sigmoid(z) = 0.5*tanh(0.5*z) + 0.5 (exact identity); tanh(z) = tanh(z).
    # One EUP tanh over the whole (B, 4H) gate block instead of 4 EUP calls.
    col = jax.lax.broadcasted_iota(jnp.int32, (batch, 4 * hdim), 1)
    is_g = (col >= 2 * hdim) & (col < 3 * hdim)
    pre = jnp.where(is_g, 1.0, 0.5).astype(jnp.float32)    # scale before tanh
    post = jnp.where(is_g, 0.0, 0.5).astype(jnp.float32)   # offset after tanh

    def cell(gates, c):
        t = jnp.tanh(gates * pre)
        act = t * pre + post            # i|f|o -> sigmoid(gate), g -> tanh(gate)
        i = act[:, 0 * hdim:1 * hdim]
        f = act[:, 1 * hdim:2 * hdim]
        gg = act[:, 2 * hdim:3 * hdim]
        o = act[:, 3 * hdim:4 * hdim]
        c_new = f * c + i * gg
        h_new = o * jnp.tanh(c_new)
        return h_new, c_new

    # ---- hoisted, off-chain work -------------------------------------------
    whh1 = whh1_ref[...]
    wih2 = wih2_ref[...]
    whh2 = whh2_ref[...]
    # Layer-1 input projection for the WHOLE sequence; b1 folded in through the
    # ones column appended to x in the wrapper.
    xproj1 = jnp.dot(x_ref[...], wih1_ref[...],
                     preferred_element_type=jnp.float32)         # (n, 4H)
    b2 = jnp.broadcast_to(b2_ref[...], (batch, 4 * hdim))        # hoisted bcast
    wfc = wfc_ref[...]
    bfc = bfc_ref[...]                                           # (O, 1)

    h1, c1 = h0_ref[0], c0_ref[0]
    h2, c2 = h0_ref[1], c0_ref[1]

    # TODO(synk): nn.LSTM inter-layer dropout(p=0.4) is train-mode-only and
    # stochastic; eval-mode semantics (identity between layers) implemented.

    # ---- wavefront-interleaved recurrence: seq+1 wavefronts -----------------
    part2 = None
    for w in range(seq + 1):
        part2_prev = part2
        if w < seq:
            # Layer-1 step w (on the h1 chain).
            g1 = xproj1[w * batch:(w + 1) * batch, :] + jnp.dot(
                h1, whh1, preferred_element_type=jnp.float32)
            h1, c1 = cell(g1, c1)
            # Layer-2 input projection for step w: consumed one wavefront
            # later, so this matmul and the +b2 sit OFF the layer-2 chain.
            part2 = jnp.dot(h1, wih2, preferred_element_type=jnp.float32) + b2
        if w >= 1:
            # Layer-2 step w-1 (on the h2 chain) — independent of layer-1
            # step w above, so the two streams overlap inside the wavefront.
            g2 = part2_prev + jnp.dot(h2, whh2,
                                      preferred_element_type=jnp.float32)
            h2, c2 = cell(g2, c2)
            # ReLU + FC head per step (off-chain, hidden under MXU/EUP).
            t = w - 1
            y = jnp.maximum(h2, 0.0)
            out_t = jnp.einsum("oh,bh->ob", wfc, y,
                               preferred_element_type=jnp.float32) + bfc
            out_ref[:, t * batch:(t + 1) * batch] = out_t


# ---------------------------------------------------------------------------
# Wrapper: one pallas_call, grid over independent sequence groups.
# ---------------------------------------------------------------------------
def lstm_model_forward(x, layer_params, h0, c0, w_fc, b_fc, *, groups=GROUPS):
    """x: (seq, batch, in). h0/c0: (layers, batch, hidden). w_fc: (out, hidden)."""
    seq, tb, in_dim = x.shape
    assert tb % groups == 0
    bg = tb // groups
    n = seq * bg
    out_dim = w_fc.shape[0]
    (wih1_t, whh1_t, b1), (wih2_t, whh2_t, b2) = layer_params

    # Fold layer-1 bias into the hoisted input projection: ones column on x,
    # bias row appended to W_ih1^T.
    x_aug = jnp.concatenate([x, jnp.ones((seq, tb, 1), x.dtype)], axis=-1)
    wih1_aug = jnp.concatenate([wih1_t, b1.reshape(1, -1)], axis=0)

    # Split the batch into `groups` independent sequence groups (grid axis;
    # sharded across TensorCores on v7x). Row index inside a group = t*bg + b.
    x_g = (x_aug.reshape(seq, groups, bg, in_dim + 1)
           .transpose(1, 0, 2, 3).reshape(groups, n, in_dim + 1))
    h0_g = h0.reshape(h0.shape[0], groups, bg, -1).transpose(1, 0, 2, 3)
    c0_g = c0.reshape(c0.shape[0], groups, bg, -1).transpose(1, 0, 2, 3)

    args = (x_g, wih1_aug, whh1_t, wih2_t, whh2_t, b2.reshape(1, -1),
            h0_g, c0_g, w_fc, b_fc.reshape(out_dim, 1))
    grouped = {0, 6, 7}            # args carrying a leading group axis

    in_specs = []
    for idx, a in enumerate(args):
        if idx in grouped:
            rest = tuple(a.shape[1:])
            in_specs.append(pl.BlockSpec(
                (None,) + rest, lambda g, _n=len(rest): (g,) + (0,) * _n))
        else:
            in_specs.append(pl.BlockSpec(
                tuple(a.shape), lambda g, _n=a.ndim: (0,) * _n))

    out_g = pl.pallas_call(
        fused_lstm_kernel,
        out_shape=jax.ShapeDtypeStruct((groups, out_dim, n), jnp.float32),
        grid_spec=pltpu.PrefetchScalarGridSpec(
            num_scalar_prefetch=0,
            grid=(groups,),
            in_specs=in_specs,
            out_specs=pl.BlockSpec((None, out_dim, n), lambda g: (g, 0, 0)),
        ),
        compiler_params=pltpu.CompilerParams(
            dimension_semantics=("parallel",)),   # megacore sharding on v7x
    )(*args)

    # (groups, out, seq*bg) -> (seq, batch, out); kernel column = t*bg + b.
    return (out_g.reshape(groups, out_dim, seq, bg)
            .transpose(2, 0, 3, 1).reshape(seq, tb, out_dim))


# ---------------------------------------------------------------------------
# Pure-JAX reference.
# ---------------------------------------------------------------------------
def lstm_model_ref(x, layer_params, h0, c0, w_fc_t, b_fc):
    inp = x
    for l, (wih_t, whh_t, b) in enumerate(layer_params):
        h, c = h0[l], c0[l]
        outs = []
        for t in range(inp.shape[0]):
            gates = inp[t] @ wih_t + h @ whh_t + b
            H = h.shape[-1]
            i = jax.nn.sigmoid(gates[:, :H])
            f = jax.nn.sigmoid(gates[:, H:2 * H])
            g = jnp.tanh(gates[:, 2 * H:3 * H])
            o = jax.nn.sigmoid(gates[:, 3 * H:])
            c = f * c + i * g
            h = o * jnp.tanh(c)
            outs.append(h)
        inp = jnp.stack(outs)
    y = jnp.maximum(inp, 0.0)
    return y @ w_fc_t + b_fc


if __name__ == "__main__":
    key = jax.random.PRNGKey(0)
    kx, kh, kc, kp = jax.random.split(key, 4)

    x = jax.random.normal(kx, (SEQ, TOTAL_BATCH, INPUT), jnp.float32)
    # Deterministic stand-ins for torch.randn h_0 / c_0 in the module forward.
    h0 = jax.random.normal(kh, (LAYERS, TOTAL_BATCH, HIDDEN), jnp.float32)
    c0 = jax.random.normal(kc, (LAYERS, TOTAL_BATCH, HIDDEN), jnp.float32)

    # PyTorch-style uniform(-1/sqrt(H), 1/sqrt(H)) init, deterministic.
    bound = 1.0 / np.sqrt(HIDDEN)
    pkeys = jax.random.split(kp, LAYERS * 4 + 2)
    layer_params = []
    for l in range(LAYERS):
        in_dim = INPUT if l == 0 else HIDDEN
        k0, k1, k2, k3 = pkeys[4 * l:4 * l + 4]
        wih = jax.random.uniform(k0, (4 * HIDDEN, in_dim), jnp.float32, -bound, bound)
        whh = jax.random.uniform(k1, (4 * HIDDEN, HIDDEN), jnp.float32, -bound, bound)
        b_ih = jax.random.uniform(k2, (4 * HIDDEN,), jnp.float32, -bound, bound)
        b_hh = jax.random.uniform(k3, (4 * HIDDEN,), jnp.float32, -bound, bound)
        layer_params.append((wih.T, whh.T, (b_ih + b_hh).reshape(1, 4 * HIDDEN)))
    kw, kb = pkeys[-2], pkeys[-1]
    w_fc = jax.random.uniform(kw, (OUTPUT, HIDDEN), jnp.float32, -bound, bound)
    b_fc = jax.random.uniform(kb, (OUTPUT,), jnp.float32, -bound, bound)

    out = lstm_model_forward(x, layer_params, h0, c0, w_fc, b_fc, groups=GROUPS)
    out = jax.block_until_ready(out)

    ref = lstm_model_ref(x, layer_params, h0, c0, w_fc.T, b_fc.reshape(1, OUTPUT))
    assert out.shape == (SEQ, TOTAL_BATCH, OUTPUT)
    np.testing.assert_allclose(np.asarray(out), np.asarray(ref),
                               rtol=1e-4, atol=1e-4)
    print("KERNEL_OK")
</pallas_src>

<mosaic_0001>
module attributes {stable_mosaic.version = 11 : i64} {
  func.func @fused_lstm_kernel(%arg0: i32, %arg1: memref<1x64x15xf32, #tpu.memory_space<vmem>>, %arg2: memref<15x128xf32, #tpu.memory_space<vmem>>, %arg3: memref<32x128xf32, #tpu.memory_space<vmem>>, %arg4: memref<32x128xf32, #tpu.memory_space<vmem>>, %arg5: memref<32x128xf32, #tpu.memory_space<vmem>>, %arg6: memref<1x128xf32, #tpu.memory_space<vmem>>, %arg7: memref<1x2x8x32xf32, #tpu.memory_space<vmem>>, %arg8: memref<1x2x8x32xf32, #tpu.memory_space<vmem>>, %arg9: memref<1x32xf32, #tpu.memory_space<vmem>>, %arg10: memref<1x1xf32, #tpu.memory_space<vmem>>, %arg11: memref<1x1x64xf32, #tpu.memory_space<vmem>>) attributes {dimension_semantics = [#tpu.dimension_semantics<parallel>], iteration_bounds = array<i64: 2>, scalar_prefetch = 0 : i64, scratch_operands = 0 : i64, tpu.core_type = #tpu.core_type<tc>, window_params = [{transform_indices = @transform_0, window_bounds = array<i64: 1, 64, 15>}, {pipeline_mode = #tpu.pipeline_mode<synchronous>, transform_indices = @transform_1, window_bounds = array<i64: 15, 128>}, {pipeline_mode = #tpu.pipeline_mode<synchronous>, transform_indices = @transform_2, window_bounds = array<i64: 32, 128>}, {pipeline_mode = #tpu.pipeline_mode<synchronous>, transform_indices = @transform_3, window_bounds = array<i64: 32, 128>}, {pipeline_mode = #tpu.pipeline_mode<synchronous>, transform_indices = @transform_4, window_bounds = array<i64: 32, 128>}, {pipeline_mode = #tpu.pipeline_mode<synchronous>, transform_indices = @transform_5, window_bounds = array<i64: 1, 128>}, {transform_indices = @transform_6, window_bounds = array<i64: 1, 2, 8, 32>}, {transform_indices = @transform_7, window_bounds = array<i64: 1, 2, 8, 32>}, {pipeline_mode = #tpu.pipeline_mode<synchronous>, transform_indices = @transform_8, window_bounds = array<i64: 1, 32>}, {pipeline_mode = #tpu.pipeline_mode<synchronous>, transform_indices = @transform_9, window_bounds = array<i64: 1, 1>}, {transform_indices = @transform_10, window_bounds = array<i64: 1, 1, 64>}]} {
    %0 = tpu.iota {dimensions = array<i32: 1>} : vector<8x128xi32>
    %c64_i32 = arith.constant 64 : i32
    %1 = vector.broadcast %c64_i32 : i32 to vector<8x128xi32>
    %2 = arith.cmpi sge, %0, %1 : vector<8x128xi32>
    %c96_i32 = arith.constant 96 : i32
    %3 = vector.broadcast %c96_i32 : i32 to vector<8x128xi32>
    %4 = arith.cmpi slt, %0, %3 : vector<8x128xi32>
    %5 = arith.andi %2, %4 : vector<8x128xi1>
    %cst = arith.constant 1.000000e+00 : f32
    %cst_0 = arith.constant 5.000000e-01 : f32
    %6 = vector.broadcast %cst : f32 to vector<8x128xf32>
    %7 = vector.broadcast %cst_0 : f32 to vector<8x128xf32>
    %8 = arith.select %5, %6, %7 : vector<8x128xi1>, vector<8x128xf32>
    %cst_1 = arith.constant 0.000000e+00 : f32
    %cst_2 = arith.constant 5.000000e-01 : f32
    %9 = vector.broadcast %cst_1 : f32 to vector<8x128xf32>
    %10 = vector.broadcast %cst_2 : f32 to vector<8x128xf32>
    %11 = arith.select %5, %9, %10 : vector<8x128xi1>, vector<8x128xf32>
    %c0 = arith.constant 0 : index
    %c0_3 = arith.constant 0 : index
    %12 = vector.load %arg3[%c0, %c0_3] : memref<32x128xf32, #tpu.memory_space<vmem>>, vector<32x128xf32>
    %c0_4 = arith.constant 0 : index
    %c0_5 = arith.constant 0 : index
    %13 = vector.load %arg4[%c0_4, %c0_5] : memref<32x128xf32, #tpu.memory_space<vmem>>, vector<32x128xf32>
    %c0_6 = arith.constant 0 : index
    %c0_7 = arith.constant 0 : index
    %14 = vector.load %arg5[%c0_6, %c0_7] : memref<32x128xf32, #tpu.memory_space<vmem>>, vector<32x128xf32>
    %c0_8 = arith.constant 0 : index
    %c0_9 = arith.constant 0 : index
    %c0_10 = arith.constant 0 : index
    %15 = vector.load %arg1[%c0_8, %c0_9, %c0_10] : memref<1x64x15xf32, #tpu.memory_space<vmem>>, vector<1x64x15xf32>
    %16 = vector.shape_cast %15 : vector<1x64x15xf32> to vector<64x15xf32>
    %c0_11 = arith.constant 0 : index
    %c0_12 = arith.constant 0 : index
    %17 = vector.load %arg2[%c0_11, %c0_12] : memref<15x128xf32, #tpu.memory_space<vmem>>, vector<15x128xf32>
    %cst_13 = arith.constant dense<0.000000e+00> : vector<64x128xf32>
    %18 = tpu.matmul %16, %17, %cst_13 {dimension_numbers = #tpu.dot_dimension_numbers<[1], [0], [0], [1], [0, 0, 1, 1], [], []>} : vector<64x15xf32>, vector<15x128xf32>, vector<64x128xf32> -> vector<64x128xf32>
    %c0_14 = arith.constant 0 : index
    %c0_15 = arith.constant 0 : index
    %19 = vector.load %arg6[%c0_14, %c0_15] : memref<1x128xf32, #tpu.memory_space<vmem>>, vector<1x128xf32>
    %20 = vector.shape_cast %19 : vector<1x128xf32> to vector<1x128xf32>
    %21 = vector.broadcast %20 : vector<1x128xf32> to vector<8x128xf32>
    %c0_16 = arith.constant 0 : index
    %c0_17 = arith.constant 0 : index
    %22 = vector.load %arg9[%c0_16, %c0_17] : memref<1x32xf32, #tpu.memory_space<vmem>>, vector<1x32xf32>
    %c0_18 = arith.constant 0 : index
    %c0_19 = arith.constant 0 : index
    %23 = vector.load %arg10[%c0_18, %c0_19] : memref<1x1xf32, #tpu.memory_space<vmem>>, vector<1x1xf32>
    %c0_20 = arith.constant 0 : index
    %c0_21 = arith.constant 0 : index
    %c0_22 = arith.constant 0 : index
    %c0_23 = arith.constant 0 : index
    %24 = vector.load %arg7[%c0_20, %c0_21, %c0_22, %c0_23] : memref<1x2x8x32xf32, #tpu.memory_space<vmem>>, vector<1x1x8x32xf32>
    %25 = vector.shape_cast %24 : vector<1x1x8x32xf32> to vector<8x32xf32>
    %c0_24 = arith.constant 0 : index
    %c0_25 = arith.constant 0 : index
    %c0_26 = arith.constant 0 : index
    %c0_27 = arith.constant 0 : index
    %26 = vector.load %arg8[%c0_24, %c0_25, %c0_26, %c0_27] : memref<1x2x8x32xf32, #tpu.memory_space<vmem>>, vector<1x1x8x32xf32>
    %27 = vector.shape_cast %26 : vector<1x1x8x32xf32> to vector<8x32xf32>
    %c0_28 = arith.constant 0 : index
    %c1 = arith.constant 1 : index
    %c0_29 = arith.constant 0 : index
    %c0_30 = arith.constant 0 : index
    %28 = vector.load %arg7[%c0_28, %c1, %c0_29, %c0_30] : memref<1x2x8x32xf32, #tpu.memory_space<vmem>>, vector<1x1x8x32xf32>
    %29 = vector.shape_cast %28 : vector<1x1x8x32xf32> to vector<8x32xf32>
    %c0_31 = arith.constant 0 : index
    %c1_32 = arith.constant 1 : index
    %c0_33 = arith.constant 0 : index
    %c0_34 = arith.constant 0 : index
    %30 = vector.load %arg8[%c0_31, %c1_32, %c0_33, %c0_34] : memref<1x2x8x32xf32, #tpu.memory_space<vmem>>, vector<1x1x8x32xf32>
    %31 = vector.shape_cast %30 : vector<1x1x8x32xf32> to vector<8x32xf32>
    %32 = vector.extract_strided_slice %18 {offsets = [0, 0], sizes = [8, 128], strides = [1, 1]} : vector<64x128xf32> to vector<8x128xf32>
    %cst_35 = arith.constant dense<0.000000e+00> : vector<8x128xf32>
    %33 = tpu.matmul %25, %12, %cst_35 {dimension_numbers = #tpu.dot_dimension_numbers<[1], [0], [0], [1], [0, 0, 1, 1], [], []>} : vector<8x32xf32>, vector<32x128xf32>, vector<8x128xf32> -> vector<8x128xf32>
    %34 = arith.addf %32, %33 : vector<8x128xf32>
    %35 = arith.mulf %34, %8 : vector<8x128xf32>
    %36 = math.tanh %35 : vector<8x128xf32>
    %37 = arith.mulf %36, %8 : vector<8x128xf32>
    %38 = arith.addf %37, %11 : vector<8x128xf32>
    %39 = vector.extract_strided_slice %38 {offsets = [0, 0], sizes = [8, 32], strides = [1, 1]} : vector<8x128xf32> to vector<8x32xf32>
    %40 = vector.extract_strided_slice %38 {offsets = [0, 32], sizes = [8, 32], strides = [1, 1]} : vector<8x128xf32> to vector<8x32xf32>
    %41 = vector.extract_strided_slice %38 {offsets = [0, 64], sizes = [8, 32], strides = [1, 1]} : vector<8x128xf32> to vector<8x32xf32>
    %42 = vector.extract_strided_slice %38 {offsets = [0, 96], sizes = [8, 32], strides = [1, 1]} : vector<8x128xf32> to vector<8x32xf32>
    %43 = arith.mulf %40, %27 : vector<8x32xf32>
    %44 = arith.mulf %39, %41 : vector<8x32xf32>
    %45 = arith.addf %43, %44 : vector<8x32xf32>
    %46 = math.tanh %45 : vector<8x32xf32>
    %47 = arith.mulf %42, %46 : vector<8x32xf32>
    %cst_36 = arith.constant dense<0.000000e+00> : vector<8x128xf32>
    %48 = tpu.matmul %47, %13, %cst_36 {dimension_numbers = #tpu.dot_dimension_numbers<[1], [0], [0], [1], [0, 0, 1, 1], [], []>} : vector<8x32xf32>, vector<32x128xf32>, vector<8x128xf32> -> vector<8x128xf32>
    %49 = arith.addf %48, %21 : vector<8x128xf32>
    %50 = vector.extract_strided_slice %18 {offsets = [8, 0], sizes = [8, 128], strides = [1, 1]} : vector<64x128xf32> to vector<8x128xf32>
    %cst_37 = arith.constant dense<0.000000e+00> : vector<8x128xf32>
    %51 = tpu.matmul %47, %12, %cst_37 {dimension_numbers = #tpu.dot_dimension_numbers<[1], [0], [0], [1], [0, 0, 1, 1], [], []>} : vector<8x32xf32>, vector<32x128xf32>, vector<8x128xf32> -> vector<8x128xf32>
    %52 = arith.addf %50, %51 : vector<8x128xf32>
    %53 = arith.mulf %52, %8 : vector<8x128xf32>
    %54 = math.tanh %53 : vector<8x128xf32>
    %55 = arith.mulf %54, %8 : vector<8x128xf32>
    %56 = arith.addf %55, %11 : vector<8x128xf32>
    %57 = vector.extract_strided_slice %56 {offsets = [0, 0], sizes = [8, 32], strides = [1, 1]} : vector<8x128xf32> to vector<8x32xf32>
    %58 = vector.extract_strided_slice %56 {offsets = [0, 32], sizes = [8, 32], strides = [1, 1]} : vector<8x128xf32> to vector<8x32xf32>
    %59 = vector.extract_strided_slice %56 {offsets = [0, 64], sizes = [8, 32], strides = [1, 1]} : vector<8x128xf32> to vector<8x32xf32>
    %60 = vector.extract_strided_slice %56 {offsets = [0, 96], sizes = [8, 32], strides = [1, 1]} : vector<8x128xf32> to vector<8x32xf32>
    %61 = arith.mulf %58, %45 : vector<8x32xf32>
    %62 = arith.mulf %57, %59 : vector<8x32xf32>
    %63 = arith.addf %61, %62 : vector<8x32xf32>
    %64 = math.tanh %63 : vector<8x32xf32>
    %65 = arith.mulf %60, %64 : vector<8x32xf32>
    %cst_38 = arith.constant dense<0.000000e+00> : vector<8x128xf32>
    %66 = tpu.matmul %65, %13, %cst_38 {dimension_numbers = #tpu.dot_dimension_numbers<[1], [0], [0], [1], [0, 0, 1, 1], [], []>} : vector<8x32xf32>, vector<32x128xf32>, vector<8x128xf32> -> vector<8x128xf32>
    %67 = arith.addf %66, %21 : vector<8x128xf32>
    %cst_39 = arith.constant dense<0.000000e+00> : vector<8x128xf32>
    %68 = tpu.matmul %29, %14, %cst_39 {dimension_numbers = #tpu.dot_dimension_numbers<[1], [0], [0], [1], [0, 0, 1, 1], [], []>} : vector<8x32xf32>, vector<32x128xf32>, vector<8x128xf32> -> vector<8x128xf32>
    %69 = arith.addf %49, %68 : vector<8x128xf32>
    %70 = arith.mulf %69, %8 : vector<8x128xf32>
    %71 = math.tanh %70 : vector<8x128xf32>
    %72 = arith.mulf %71, %8 : vector<8x128xf32>
    %73 = arith.addf %72, %11 : vector<8x128xf32>
    %74 = vector.extract_strided_slice %73 {offsets = [0, 0], sizes = [8, 32], strides = [1, 1]} : vector<8x128xf32> to vector<8x32xf32>
    %75 = vector.extract_strided_slice %73 {offsets = [0, 32], sizes = [8, 32], strides = [1, 1]} : vector<8x128xf32> to vector<8x32xf32>
    %76 = vector.extract_strided_slice %73 {offsets = [0, 64], sizes = [8, 32], strides = [1, 1]} : vector<8x128xf32> to vector<8x32xf32>
    %77 = vector.extract_strided_slice %73 {offsets = [0, 96], sizes = [8, 32], strides = [1, 1]} : vector<8x128xf32> to vector<8x32xf32>
    %78 = arith.mulf %75, %31 : vector<8x32xf32>
    %79 = arith.mulf %74, %76 : vector<8x32xf32>
    %80 = arith.addf %78, %79 : vector<8x32xf32>
    %81 = math.tanh %80 : vector<8x32xf32>
    %82 = arith.mulf %77, %81 : vector<8x32xf32>
    %cst_40 = arith.constant 0.000000e+00 : f32
    %83 = vector.broadcast %cst_40 : f32 to vector<8x32xf32>
    %84 = arith.maximumf %82, %83 : vector<8x32xf32>
    "tpu.trace_start"() <{level = 10 : i32, message = "oh,bh->ob"}> : () -> ()
    %cst_41 = arith.constant dense<0.000000e+00> : vector<1x8xf32>
    %85 = tpu.matmul %22, %84, %cst_41 {dimension_numbers = #tpu.dot_dimension_numbers<[1], [1], [0], [0], [0, 0, 1, 0], [], []>} : vector<1x32xf32>, vector<8x32xf32>, vector<1x8xf32> -> vector<1x8xf32>
    "tpu.trace_stop"() : () -> ()
    %86 = vector.broadcast %23 : vector<1x1xf32> to vector<1x8xf32>
    %87 = arith.addf %85, %86 : vector<1x8xf32>
    %c0_42 = arith.constant 0 : index
    %c0_43 = arith.constant 0 : index
    %c0_44 = arith.constant 0 : index
    %88 = vector.load %arg11[%c0_42, %c0_43, %c0_44] : memref<1x1x64xf32, #tpu.memory_space<vmem>>, vector<1x1x8xf32>
    %89 = vector.shape_cast %88 : vector<1x1x8xf32> to vector<1x8xf32>
    %90 = vector.shape_cast %87 : vector<1x8xf32> to vector<1x1x8xf32>
    tpu.vector_store %arg11[%c0_42, %c0_43, %c0_44], %90 {strides = array<i32>} : memref<1x1x64xf32, #tpu.memory_space<vmem>>, vector<1x1x8xf32>,
    %91 = vector.extract_strided_slice %18 {offsets = [16, 0], sizes = [8, 128], strides = [1, 1]} : vector<64x128xf32> to vector<8x128xf32>
    %cst_45 = arith.constant dense<0.000000e+00> : vector<8x128xf32>
    %92 = tpu.matmul %65, %12, %cst_45 {dimension_numbers = #tpu.dot_dimension_numbers<[1], [0], [0], [1], [0, 0, 1, 1], [], []>} : vector<8x32xf32>, vector<32x128xf32>, vector<8x128xf32> -> vector<8x128xf32>
    %93 = arith.addf %91, %92 : vector<8x128xf32>
    %94 = arith.mulf %93, %8 : vector<8x128xf32>
    %95 = math.tanh %94 : vector<8x128xf32>
    %96 = arith.mulf %95, %8 : vector<8x128xf32>
    %97 = arith.addf %96, %11 : vector<8x128xf32>
    %98 = vector.extract_strided_slice %97 {offsets = [0, 0], sizes = [8, 32], strides = [1, 1]} : vector<8x128xf32> to vector<8x32xf32>
    %99 = vector.extract_strided_slice %97 {offsets = [0, 32], sizes = [8, 32], strides = [1, 1]} : vector<8x128xf32> to vector<8x32xf32>
    %100 = vector.extract_strided_slice %97 {offsets = [0, 64], sizes = [8, 32], strides = [1, 1]} : vector<8x128xf32> to vector<8x32xf32>
    %101 = vector.extract_strided_slice %97 {offsets = [0, 96], sizes = [8, 32], strides = [1, 1]} : vector<8x128xf32> to vector<8x32xf32>
    %102 = arith.mulf %99, %63 : vector<8x32xf32>
    %103 = arith.mulf %98, %100 : vector<8x32xf32>
    %104 = arith.addf %102, %103 : vector<8x32xf32>
    %105 = math.tanh %104 : vector<8x32xf32>
    %106 = arith.mulf %101, %105 : vector<8x32xf32>
    %cst_46 = arith.constant dense<0.000000e+00> : vector<8x128xf32>
    %107 = tpu.matmul %106, %13, %cst_46 {dimension_numbers = #tpu.dot_dimension_numbers<[1], [0], [0], [1], [0, 0, 1, 1], [], []>} : vector<8x32xf32>, vector<32x128xf32>, vector<8x128xf32> -> vector<8x128xf32>
    %108 = arith.addf %107, %21 : vector<8x128xf32>
    %cst_47 = arith.constant dense<0.000000e+00> : vector<8x128xf32>
    %109 = tpu.matmul %82, %14, %cst_47 {dimension_numbers = #tpu.dot_dimension_numbers<[1], [0], [0], [1], [0, 0, 1, 1], [], []>} : vector<8x32xf32>, vector<32x128xf32>, vector<8x128xf32> -> vector<8x128xf32>
    %110 = arith.addf %67, %109 : vector<8x128xf32>
    %111 = arith.mulf %110, %8 : vector<8x128xf32>
    %112 = math.tanh %111 : vector<8x128xf32>
    %113 = arith.mulf %112, %8 : vector<8x128xf32>
    %114 = arith.addf %113, %11 : vector<8x128xf32>
    %115 = vector.extract_strided_slice %114 {offsets = [0, 0], sizes = [8, 32], strides = [1, 1]} : vector<8x128xf32> to vector<8x32xf32>
    %116 = vector.extract_strided_slice %114 {offsets = [0, 32], sizes = [8, 32], strides = [1, 1]} : vector<8x128xf32> to vector<8x32xf32>
    %117 = vector.extract_strided_slice %114 {offsets = [0, 64], sizes = [8, 32], strides = [1, 1]} : vector<8x128xf32> to vector<8x32xf32>
    %118 = vector.extract_strided_slice %114 {offsets = [0, 96], sizes = [8, 32], strides = [1, 1]} : vector<8x128xf32> to vector<8x32xf32>
    %119 = arith.mulf %116, %80 : vector<8x32xf32>
    %120 = arith.mulf %115, %117 : vector<8x32xf32>
    %121 = arith.addf %119, %120 : vector<8x32xf32>
    %122 = math.tanh %121 : vector<8x32xf32>
    %123 = arith.mulf %118, %122 : vector<8x32xf32>
    %cst_48 = arith.constant 0.000000e+00 : f32
    %124 = vector.broadcast %cst_48 : f32 to vector<8x32xf32>
    %125 = arith.maximumf %123, %124 : vector<8x32xf32>
    "tpu.trace_start"() <{level = 10 : i32, message = "oh,bh->ob"}> : () -> ()
    %cst_49 = arith.constant dense<0.000000e+00> : vector<1x8xf32>
    %126 = tpu.matmul %22, %125, %cst_49 {dimension_numbers = #tpu.dot_dimension_numbers<[1], [1], [0], [0], [0, 0, 1, 0], [], []>} : vector<1x32xf32>, vector<8x32xf32>, vector<1x8xf32> -> vector<1x8xf32>
    "tpu.trace_stop"() : () -> ()
    %127 = vector.broadcast %23 : vector<1x1xf32> to vector<1x8xf32>
    %128 = arith.addf %126, %127 : vector<1x8xf32>
    %c0_50 = arith.constant 0 : index
    %c0_51 = arith.constant 0 : index
    %c8 = arith.constant 8 : index
    %129 = vector.load %arg11[%c0_50, %c0_51, %c8] : memref<1x1x64xf32, #tpu.memory_space<vmem>>, vector<1x1x8xf32>
    %130 = vector.shape_cast %129 : vector<1x1x8xf32> to vector<1x8xf32>
    %131 = vector.shape_cast %128 : vector<1x8xf32> to vector<1x1x8xf32>
    tpu.vector_store %arg11[%c0_50, %c0_51, %c8], %131 {strides = array<i32>} : memref<1x1x64xf32, #tpu.memory_space<vmem>>, vector<1x1x8xf32>,
    %132 = vector.extract_strided_slice %18 {offsets = [24, 0], sizes = [8, 128], strides = [1, 1]} : vector<64x128xf32> to vector<8x128xf32>
    %cst_52 = arith.constant dense<0.000000e+00> : vector<8x128xf32>
    %133 = tpu.matmul %106, %12, %cst_52 {dimension_numbers = #tpu.dot_dimension_numbers<[1], [0], [0], [1], [0, 0, 1, 1], [], []>} : vector<8x32xf32>, vector<32x128xf32>, vector<8x128xf32> -> vector<8x128xf32>
    %134 = arith.addf %132, %133 : vector<8x128xf32>
    %135 = arith.mulf %134, %8 : vector<8x128xf32>
    %136 = math.tanh %135 : vector<8x128xf32>
    %137 = arith.mulf %136, %8 : vector<8x128xf32>
    %138 = arith.addf %137, %11 : vector<8x128xf32>
    %139 = vector.extract_strided_slice %138 {offsets = [0, 0], sizes = [8, 32], strides = [1, 1]} : vector<8x128xf32> to vector<8x32xf32>
    %140 = vector.extract_strided_slice %138 {offsets = [0, 32], sizes = [8, 32], strides = [1, 1]} : vector<8x128xf32> to vector<8x32xf32>
    %141 = vector.extract_strided_slice %138 {offsets = [0, 64], sizes = [8, 32], strides = [1, 1]} : vector<8x128xf32> to vector<8x32xf32>
    %142 = vector.extract_strided_slice %138 {offsets = [0, 96], sizes = [8, 32], strides = [1, 1]} : vector<8x128xf32> to vector<8x32xf32>
    %143 = arith.mulf %140, %104 : vector<8x32xf32>
    %144 = arith.mulf %139, %141 : vector<8x32xf32>
    %145 = arith.addf %143, %144 : vector<8x32xf32>
    %146 = math.tanh %145 : vector<8x32xf32>
    %147 = arith.mulf %142, %146 : vector<8x32xf32>
    %cst_53 = arith.constant dense<0.000000e+00> : vector<8x128xf32>
    %148 = tpu.matmul %147, %13, %cst_53 {dimension_numbers = #tpu.dot_dimension_numbers<[1], [0], [0], [1], [0, 0, 1, 1], [], []>} : vector<8x32xf32>, vector<32x128xf32>, vector<8x128xf32> -> vector<8x128xf32>
    %149 = arith.addf %148, %21 : vector<8x128xf32>
    %cst_54 = arith.constant dense<0.000000e+00> : vector<8x128xf32>
    %150 = tpu.matmul %123, %14, %cst_54 {dimension_numbers = #tpu.dot_dimension_numbers<[1], [0], [0], [1], [0, 0, 1, 1], [], []>} : vector<8x32xf32>, vector<32x128xf32>, vector<8x128xf32> -> vector<8x128xf32>
    %151 = arith.addf %108, %150 : vector<8x128xf32>
    %152 = arith.mulf %151, %8 : vector<8x128xf32>
    %153 = math.tanh %152 : vector<8x128xf32>
    %154 = arith.mulf %153, %8 : vector<8x128xf32>
    %155 = arith.addf %154, %11 : vector<8x128xf32>
    %156 = vector.extract_strided_slice %155 {offsets = [0, 0], sizes = [8, 32], strides = [1, 1]} : vector<8x128xf32> to vector<8x32xf32>
    %157 = vector.extract_strided_slice %155 {offsets = [0, 32], sizes = [8, 32], strides = [1, 1]} : vector<8x128xf32> to vector<8x32xf32>
    %158 = vector.extract_strided_slice %155 {offsets = [0, 64], sizes = [8, 32], strides = [1, 1]} : vector<8x128xf32> to vector<8x32xf32>
    %159 = vector.extract_strided_slice %155 {offsets = [0, 96], sizes = [8, 32], strides = [1, 1]} : vector<8x128xf32> to vector<8x32xf32>
    %160 = arith.mulf %157, %121 : vector<8x32xf32>
    %161 = arith.mulf %156, %158 : vector<8x32xf32>
    %162 = arith.addf %160, %161 : vector<8x32xf32>
    %163 = math.tanh %162 : vector<8x32xf32>
    %164 = arith.mulf %159, %163 : vector<8x32xf32>
    %cst_55 = arith.constant 0.000000e+00 : f32
    %165 = vector.broadcast %cst_55 : f32 to vector<8x32xf32>
    %166 = arith.maximumf %164, %165 : vector<8x32xf32>
    "tpu.trace_start"() <{level = 10 : i32, message = "oh,bh->ob"}> : () -> ()
    %cst_56 = arith.constant dense<0.000000e+00> : vector<1x8xf32>
    %167 = tpu.matmul %22, %166, %cst_56 {dimension_numbers = #tpu.dot_dimension_numbers<[1], [1], [0], [0], [0, 0, 1, 0], [], []>} : vector<1x32xf32>, vector<8x32xf32>, vector<1x8xf32> -> vector<1x8xf32>
    "tpu.trace_stop"() : () -> ()
    %168 = vector.broadcast %23 : vector<1x1xf32> to vector<1x8xf32>
    %169 = arith.addf %167, %168 : vector<1x8xf32>
    %c0_57 = arith.constant 0 : index
    %c0_58 = arith.constant 0 : index
    %c16 = arith.constant 16 : index
    %170 = vector.load %arg11[%c0_57, %c0_58, %c16] : memref<1x1x64xf32, #tpu.memory_space<vmem>>, vector<1x1x8xf32>
    %171 = vector.shape_cast %170 : vector<1x1x8xf32> to vector<1x8xf32>
    %172 = vector.shape_cast %169 : vector<1x8xf32> to vector<1x1x8xf32>
    tpu.vector_store %arg11[%c0_57, %c0_58, %c16], %172 {strides = array<i32>} : memref<1x1x64xf32, #tpu.memory_space<vmem>>, vector<1x1x8xf32>,
    %173 = vector.extract_strided_slice %18 {offsets = [32, 0], sizes = [8, 128], strides = [1, 1]} : vector<64x128xf32> to vector<8x128xf32>
    %cst_59 = arith.constant dense<0.000000e+00> : vector<8x128xf32>
    %174 = tpu.matmul %147, %12, %cst_59 {dimension_numbers = #tpu.dot_dimension_numbers<[1], [0], [0], [1], [0, 0, 1, 1], [], []>} : vector<8x32xf32>, vector<32x128xf32>, vector<8x128xf32> -> vector<8x128xf32>
    %175 = arith.addf %173, %174 : vector<8x128xf32>
    %176 = arith.mulf %175, %8 : vector<8x128xf32>
    %177 = math.tanh %176 : vector<8x128xf32>
    %178 = arith.mulf %177, %8 : vector<8x128xf32>
    %179 = arith.addf %178, %11 : vector<8x128xf32>
    %180 = vector.extract_strided_slice %179 {offsets = [0, 0], sizes = [8, 32], strides = [1, 1]} : vector<8x128xf32> to vector<8x32xf32>
    %181 = vector.extract_strided_slice %179 {offsets = [0, 32], sizes = [8, 32], strides = [1, 1]} : vector<8x128xf32> to vector<8x32xf32>
    %182 = vector.extract_strided_slice %179 {offsets = [0, 64], sizes = [8, 32], strides = [1, 1]} : vector<8x128xf32> to vector<8x32xf32>
    %183 = vector.extract_strided_slice %179 {offsets = [0, 96], sizes = [8, 32], strides = [1, 1]} : vector<8x128xf32> to vector<8x32xf32>
    %184 = arith.mulf %181, %145 : vector<8x32xf32>
    %185 = arith.mulf %180, %182 : vector<8x32xf32>
    %186 = arith.addf %184, %185 : vector<8x32xf32>
    %187 = math.tanh %186 : vector<8x32xf32>
    %188 = arith.mulf %183, %187 : vector<8x32xf32>
    %cst_60 = arith.constant dense<0.000000e+00> : vector<8x128xf32>
    %189 = tpu.matmul %188, %13, %cst_60 {dimension_numbers = #tpu.dot_dimension_numbers<[1], [0], [0], [1], [0, 0, 1, 1], [], []>} : vector<8x32xf32>, vector<32x128xf32>, vector<8x128xf32> -> vector<8x128xf32>
    %190 = arith.addf %189, %21 : vector<8x128xf32>
    %cst_61 = arith.constant dense<0.000000e+00> : vector<8x128xf32>
    %191 = tpu.matmul %164, %14, %cst_61 {dimension_numbers = #tpu.dot_dimension_numbers<[1], [0], [0], [1], [0, 0, 1, 1], [], []>} : vector<8x32xf32>, vector<32x128xf32>, vector<8x128xf32> -> vector<8x128xf32>
    %192 = arith.addf %149, %191 : vector<8x128xf32>
    %193 = arith.mulf %192, %8 : vector<8x128xf32>
    %194 = math.tanh %193 : vector<8x128xf32>
    %195 = arith.mulf %194, %8 : vector<8x128xf32>
    %196 = arith.addf %195, %11 : vector<8x128xf32>
    %197 = vector.extract_strided_slice %196 {offsets = [0, 0], sizes = [8, 32], strides = [1, 1]} : vector<8x128xf32> to vector<8x32xf32>
    %198 = vector.extract_strided_slice %196 {offsets = [0, 32], sizes = [8, 32], strides = [1, 1]} : vector<8x128xf32> to vector<8x32xf32>
    %199 = vector.extract_strided_slice %196 {offsets = [0, 64], sizes = [8, 32], strides = [1, 1]} : vector<8x128xf32> to vector<8x32xf32>
    %200 = vector.extract_strided_slice %196 {offsets = [0, 96], sizes = [8, 32], strides = [1, 1]} : vector<8x128xf32> to vector<8x32xf32>
    %201 = arith.mulf %198, %162 : vector<8x32xf32>
    %202 = arith.mulf %197, %199 : vector<8x32xf32>
    %203 = arith.addf %201, %202 : vector<8x32xf32>
    %204 = math.tanh %203 : vector<8x32xf32>
    %205 = arith.mulf %200, %204 : vector<8x32xf32>
    %cst_62 = arith.constant 0.000000e+00 : f32
    %206 = vector.broadcast %cst_62 : f32 to vector<8x32xf32>
    %207 = arith.maximumf %205, %206 : vector<8x32xf32>
    "tpu.trace_start"() <{level = 10 : i32, message = "oh,bh->ob"}> : () -> ()
    %cst_63 = arith.constant dense<0.000000e+00> : vector<1x8xf32>
    %208 = tpu.matmul %22, %207, %cst_63 {dimension_numbers = #tpu.dot_dimension_numbers<[1], [1], [0], [0], [0, 0, 1, 0], [], []>} : vector<1x32xf32>, vector<8x32xf32>, vector<1x8xf32> -> vector<1x8xf32>
    "tpu.trace_stop"() : () -> ()
    %209 = vector.broadcast %23 : vector<1x1xf32> to vector<1x8xf32>
    %210 = arith.addf %208, %209 : vector<1x8xf32>
    %c0_64 = arith.constant 0 : index
    %c0_65 = arith.constant 0 : index
    %c24 = arith.constant 24 : index
    %211 = vector.load %arg11[%c0_64, %c0_65, %c24] : memref<1x1x64xf32, #tpu.memory_space<vmem>>, vector<1x1x8xf32>
    %212 = vector.shape_cast %211 : vector<1x1x8xf32> to vector<1x8xf32>
    %213 = vector.shape_cast %210 : vector<1x8xf32> to vector<1x1x8xf32>
    tpu.vector_store %arg11[%c0_64, %c0_65, %c24], %213 {strides = array<i32>} : memref<1x1x64xf32, #tpu.memory_space<vmem>>, vector<1x1x8xf32>,
    %214 = vector.extract_strided_slice %18 {offsets = [40, 0], sizes = [8, 128], strides = [1, 1]} : vector<64x128xf32> to vector<8x128xf32>
    %cst_66 = arith.constant dense<0.000000e+00> : vector<8x128xf32>
    %215 = tpu.matmul %188, %12, %cst_66 {dimension_numbers = #tpu.dot_dimension_numbers<[1], [0], [0], [1], [0, 0, 1, 1], [], []>} : vector<8x32xf32>, vector<32x128xf32>, vector<8x128xf32> -> vector<8x128xf32>
    %216 = arith.addf %214, %215 : vector<8x128xf32>
    %217 = arith.mulf %216, %8 : vector<8x128xf32>
    %218 = math.tanh %217 : vector<8x128xf32>
    %219 = arith.mulf %218, %8 : vector<8x128xf32>
    %220 = arith.addf %219, %11 : vector<8x128xf32>
    %221 = vector.extract_strided_slice %220 {offsets = [0, 0], sizes = [8, 32], strides = [1, 1]} : vector<8x128xf32> to vector<8x32xf32>
    %222 = vector.extract_strided_slice %220 {offsets = [0, 32], sizes = [8, 32], strides = [1, 1]} : vector<8x128xf32> to vector<8x32xf32>
    %223 = vector.extract_strided_slice %220 {offsets = [0, 64], sizes = [8, 32], strides = [1, 1]} : vector<8x128xf32> to vector<8x32xf32>
    %224 = vector.extract_strided_slice %220 {offsets = [0, 96], sizes = [8, 32], strides = [1, 1]} : vector<8x128xf32> to vector<8x32xf32>
    %225 = arith.mulf %222, %186 : vector<8x32xf32>
    %226 = arith.mulf %221, %223 : vector<8x32xf32>
    %227 = arith.addf %225, %226 : vector<8x32xf32>
    %228 = math.tanh %227 : vector<8x32xf32>
    %229 = arith.mulf %224, %228 : vector<8x32xf32>
    %cst_67 = arith.constant dense<0.000000e+00> : vector<8x128xf32>
    %230 = tpu.matmul %229, %13, %cst_67 {dimension_numbers = #tpu.dot_dimension_numbers<[1], [0], [0], [1], [0, 0, 1, 1], [], []>} : vector<8x32xf32>, vector<32x128xf32>, vector<8x128xf32> -> vector<8x128xf32>
    %231 = arith.addf %230, %21 : vector<8x128xf32>
    %cst_68 = arith.constant dense<0.000000e+00> : vector<8x128xf32>
    %232 = tpu.matmul %205, %14, %cst_68 {dimension_numbers = #tpu.dot_dimension_numbers<[1], [0], [0], [1], [0, 0, 1, 1], [], []>} : vector<8x32xf32>, vector<32x128xf32>, vector<8x128xf32> -> vector<8x128xf32>
    %233 = arith.addf %190, %232 : vector<8x128xf32>
    %234 = arith.mulf %233, %8 : vector<8x128xf32>
    %235 = math.tanh %234 : vector<8x128xf32>
    %236 = arith.mulf %235, %8 : vector<8x128xf32>
    %237 = arith.addf %236, %11 : vector<8x128xf32>
    %238 = vector.extract_strided_slice %237 {offsets = [0, 0], sizes = [8, 32], strides = [1, 1]} : vector<8x128xf32> to vector<8x32xf32>
    %239 = vector.extract_strided_slice %237 {offsets = [0, 32], sizes = [8, 32], strides = [1, 1]} : vector<8x128xf32> to vector<8x32xf32>
    %240 = vector.extract_strided_slice %237 {offsets = [0, 64], sizes = [8, 32], strides = [1, 1]} : vector<8x128xf32> to vector<8x32xf32>
    %241 = vector.extract_strided_slice %237 {offsets = [0, 96], sizes = [8, 32], strides = [1, 1]} : vector<8x128xf32> to vector<8x32xf32>
    %242 = arith.mulf %239, %203 : vector<8x32xf32>
    %243 = arith.mulf %238, %240 : vector<8x32xf32>
    %244 = arith.addf %242, %243 : vector<8x32xf32>
    %245 = math.tanh %244 : vector<8x32xf32>
    %246 = arith.mulf %241, %245 : vector<8x32xf32>
    %cst_69 = arith.constant 0.000000e+00 : f32
    %247 = vector.broadcast %cst_69 : f32 to vector<8x32xf32>
    %248 = arith.maximumf %246, %247 : vector<8x32xf32>
    "tpu.trace_start"() <{level = 10 : i32, message = "oh,bh->ob"}> : () -> ()
    %cst_70 = arith.constant dense<0.000000e+00> : vector<1x8xf32>
    %249 = tpu.matmul %22, %248, %cst_70 {dimension_numbers = #tpu.dot_dimension_numbers<[1], [1], [0], [0], [0, 0, 1, 0], [], []>} : vector<1x32xf32>, vector<8x32xf32>, vector<1x8xf32> -> vector<1x8xf32>
    "tpu.trace_stop"() : () -> ()
    %250 = vector.broadcast %23 : vector<1x1xf32> to vector<1x8xf32>
    %251 = arith.addf %249, %250 : vector<1x8xf32>
    %c0_71 = arith.constant 0 : index
    %c0_72 = arith.constant 0 : index
    %c32 = arith.constant 32 : index
    %252 = vector.load %arg11[%c0_71, %c0_72, %c32] : memref<1x1x64xf32, #tpu.memory_space<vmem>>, vector<1x1x8xf32>
    %253 = vector.shape_cast %252 : vector<1x1x8xf32> to vector<1x8xf32>
    %254 = vector.shape_cast %251 : vector<1x8xf32> to vector<1x1x8xf32>
    tpu.vector_store %arg11[%c0_71, %c0_72, %c32], %254 {strides = array<i32>} : memref<1x1x64xf32, #tpu.memory_space<vmem>>, vector<1x1x8xf32>,
    %255 = vector.extract_strided_slice %18 {offsets = [48, 0], sizes = [8, 128], strides = [1, 1]} : vector<64x128xf32> to vector<8x128xf32>
    %cst_73 = arith.constant dense<0.000000e+00> : vector<8x128xf32>
    %256 = tpu.matmul %229, %12, %cst_73 {dimension_numbers = #tpu.dot_dimension_numbers<[1], [0], [0], [1], [0, 0, 1, 1], [], []>} : vector<8x32xf32>, vector<32x128xf32>, vector<8x128xf32> -> vector<8x128xf32>
    %257 = arith.addf %255, %256 : vector<8x128xf32>
    %258 = arith.mulf %257, %8 : vector<8x128xf32>
    %259 = math.tanh %258 : vector<8x128xf32>
    %260 = arith.mulf %259, %8 : vector<8x128xf32>
    %261 = arith.addf %260, %11 : vector<8x128xf32>
    %262 = vector.extract_strided_slice %261 {offsets = [0, 0], sizes = [8, 32], strides = [1, 1]} : vector<8x128xf32> to vector<8x32xf32>
    %263 = vector.extract_strided_slice %261 {offsets = [0, 32], sizes = [8, 32], strides = [1, 1]} : vector<8x128xf32> to vector<8x32xf32>
    %264 = vector.extract_strided_slice %261 {offsets = [0, 64], sizes = [8, 32], strides = [1, 1]} : vector<8x128xf32> to vector<8x32xf32>
    %265 = vector.extract_strided_slice %261 {offsets = [0, 96], sizes = [8, 32], strides = [1, 1]} : vector<8x128xf32> to vector<8x32xf32>
    %266 = arith.mulf %263, %227 : vector<8x32xf32>
    %267 = arith.mulf %262, %264 : vector<8x32xf32>
    %268 = arith.addf %266, %267 : vector<8x32xf32>
    %269 = math.tanh %268 : vector<8x32xf32>
    %270 = arith.mulf %265, %269 : vector<8x32xf32>
    %cst_74 = arith.constant dense<0.000000e+00> : vector<8x128xf32>
    %271 = tpu.matmul %270, %13, %cst_74 {dimension_numbers = #tpu.dot_dimension_numbers<[1], [0], [0], [1], [0, 0, 1, 1], [], []>} : vector<8x32xf32>, vector<32x128xf32>, vector<8x128xf32> -> vector<8x128xf32>
    %272 = arith.addf %271, %21 : vector<8x128xf32>
    %cst_75 = arith.constant dense<0.000000e+00> : vector<8x128xf32>
    %273 = tpu.matmul %246, %14, %cst_75 {dimension_numbers = #tpu.dot_dimension_numbers<[1], [0], [0], [1], [0, 0, 1, 1], [], []>} : vector<8x32xf32>, vector<32x128xf32>, vector<8x128xf32> -> vector<8x128xf32>
    %274 = arith.addf %231, %273 : vector<8x128xf32>
    %275 = arith.mulf %274, %8 : vector<8x128xf32>
    %276 = math.tanh %275 : vector<8x128xf32>
    %277 = arith.mulf %276, %8 : vector<8x128xf32>
    %278 = arith.addf %277, %11 : vector<8x128xf32>
    %279 = vector.extract_strided_slice %278 {offsets = [0, 0], sizes = [8, 32], strides = [1, 1]} : vector<8x128xf32> to vector<8x32xf32>
    %280 = vector.extract_strided_slice %278 {offsets = [0, 32], sizes = [8, 32], strides = [1, 1]} : vector<8x128xf32> to vector<8x32xf32>
    %281 = vector.extract_strided_slice %278 {offsets = [0, 64], sizes = [8, 32], strides = [1, 1]} : vector<8x128xf32> to vector<8x32xf32>
    %282 = vector.extract_strided_slice %278 {offsets = [0, 96], sizes = [8, 32], strides = [1, 1]} : vector<8x128xf32> to vector<8x32xf32>
    %283 = arith.mulf %280, %244 : vector<8x32xf32>
    %284 = arith.mulf %279, %281 : vector<8x32xf32>
    %285 = arith.addf %283, %284 : vector<8x32xf32>
    %286 = math.tanh %285 : vector<8x32xf32>
    %287 = arith.mulf %282, %286 : vector<8x32xf32>
    %cst_76 = arith.constant 0.000000e+00 : f32
    %288 = vector.broadcast %cst_76 : f32 to vector<8x32xf32>
    %289 = arith.maximumf %287, %288 : vector<8x32xf32>
    "tpu.trace_start"() <{level = 10 : i32, message = "oh,bh->ob"}> : () -> ()
    %cst_77 = arith.constant dense<0.000000e+00> : vector<1x8xf32>
    %290 = tpu.matmul %22, %289, %cst_77 {dimension_numbers = #tpu.dot_dimension_numbers<[1], [1], [0], [0], [0, 0, 1, 0], [], []>} : vector<1x32xf32>, vector<8x32xf32>, vector<1x8xf32> -> vector<1x8xf32>
    "tpu.trace_stop"() : () -> ()
    %291 = vector.broadcast %23 : vector<1x1xf32> to vector<1x8xf32>
    %292 = arith.addf %290, %291 : vector<1x8xf32>
    %c0_78 = arith.constant 0 : index
    %c0_79 = arith.constant 0 : index
    %c40 = arith.constant 40 : index
    %293 = vector.load %arg11[%c0_78, %c0_79, %c40] : memref<1x1x64xf32, #tpu.memory_space<vmem>>, vector<1x1x8xf32>
    %294 = vector.shape_cast %293 : vector<1x1x8xf32> to vector<1x8xf32>
    %295 = vector.shape_cast %292 : vector<1x8xf32> to vector<1x1x8xf32>
    tpu.vector_store %arg11[%c0_78, %c0_79, %c40], %295 {strides = array<i32>} : memref<1x1x64xf32, #tpu.memory_space<vmem>>, vector<1x1x8xf32>,
    %296 = vector.extract_strided_slice %18 {offsets = [56, 0], sizes = [8, 128], strides = [1, 1]} : vector<64x128xf32> to vector<8x128xf32>
    %cst_80 = arith.constant dense<0.000000e+00> : vector<8x128xf32>
    %297 = tpu.matmul %270, %12, %cst_80 {dimension_numbers = #tpu.dot_dimension_numbers<[1], [0], [0], [1], [0, 0, 1, 1], [], []>} : vector<8x32xf32>, vector<32x128xf32>, vector<8x128xf32> -> vector<8x128xf32>
    %298 = arith.addf %296, %297 : vector<8x128xf32>
    %299 = arith.mulf %298, %8 : vector<8x128xf32>
    %300 = math.tanh %299 : vector<8x128xf32>
    %301 = arith.mulf %300, %8 : vector<8x128xf32>
    %302 = arith.addf %301, %11 : vector<8x128xf32>
    %303 = vector.extract_strided_slice %302 {offsets = [0, 0], sizes = [8, 32], strides = [1, 1]} : vector<8x128xf32> to vector<8x32xf32>
    %304 = vector.extract_strided_slice %302 {offsets = [0, 32], sizes = [8, 32], strides = [1, 1]} : vector<8x128xf32> to vector<8x32xf32>
    %305 = vector.extract_strided_slice %302 {offsets = [0, 64], sizes = [8, 32], strides = [1, 1]} : vector<8x128xf32> to vector<8x32xf32>
    %306 = vector.extract_strided_slice %302 {offsets = [0, 96], sizes = [8, 32], strides = [1, 1]} : vector<8x128xf32> to vector<8x32xf32>
    %307 = arith.mulf %304, %268 : vector<8x32xf32>
    %308 = arith.mulf %303, %305 : vector<8x32xf32>
    %309 = arith.addf %307, %308 : vector<8x32xf32>
    %310 = math.tanh %309 : vector<8x32xf32>
    %311 = arith.mulf %306, %310 : vector<8x32xf32>
    %cst_81 = arith.constant dense<0.000000e+00> : vector<8x128xf32>
    %312 = tpu.matmul %311, %13, %cst_81 {dimension_numbers = #tpu.dot_dimension_numbers<[1], [0], [0], [1], [0, 0, 1, 1], [], []>} : vector<8x32xf32>, vector<32x128xf32>, vector<8x128xf32> -> vector<8x128xf32>
    %313 = arith.addf %312, %21 : vector<8x128xf32>
    %cst_82 = arith.constant dense<0.000000e+00> : vector<8x128xf32>
    %314 = tpu.matmul %287, %14, %cst_82 {dimension_numbers = #tpu.dot_dimension_numbers<[1], [0], [0], [1], [0, 0, 1, 1], [], []>} : vector<8x32xf32>, vector<32x128xf32>, vector<8x128xf32> -> vector<8x128xf32>
    %315 = arith.addf %272, %314 : vector<8x128xf32>
    %316 = arith.mulf %315, %8 : vector<8x128xf32>
    %317 = math.tanh %316 : vector<8x128xf32>
    %318 = arith.mulf %317, %8 : vector<8x128xf32>
    %319 = arith.addf %318, %11 : vector<8x128xf32>
    %320 = vector.extract_strided_slice %319 {offsets = [0, 0], sizes = [8, 32], strides = [1, 1]} : vector<8x128xf32> to vector<8x32xf32>
    %321 = vector.extract_strided_slice %319 {offsets = [0, 32], sizes = [8, 32], strides = [1, 1]} : vector<8x128xf32> to vector<8x32xf32>
    %322 = vector.extract_strided_slice %319 {offsets = [0, 64], sizes = [8, 32], strides = [1, 1]} : vector<8x128xf32> to vector<8x32xf32>
    %323 = vector.extract_strided_slice %319 {offsets = [0, 96], sizes = [8, 32], strides = [1, 1]} : vector<8x128xf32> to vector<8x32xf32>
    %324 = arith.mulf %321, %285 : vector<8x32xf32>
    %325 = arith.mulf %320, %322 : vector<8x32xf32>
    %326 = arith.addf %324, %325 : vector<8x32xf32>
    %327 = math.tanh %326 : vector<8x32xf32>
    %328 = arith.mulf %323, %327 : vector<8x32xf32>
    %cst_83 = arith.constant 0.000000e+00 : f32
    %329 = vector.broadcast %cst_83 : f32 to vector<8x32xf32>
    %330 = arith.maximumf %328, %329 : vector<8x32xf32>
    "tpu.trace_start"() <{level = 10 : i32, message = "oh,bh->ob"}> : () -> ()
    %cst_84 = arith.constant dense<0.000000e+00> : vector<1x8xf32>
    %331 = tpu.matmul %22, %330, %cst_84 {dimension_numbers = #tpu.dot_dimension_numbers<[1], [1], [0], [0], [0, 0, 1, 0], [], []>} : vector<1x32xf32>, vector<8x32xf32>, vector<1x8xf32> -> vector<1x8xf32>
    "tpu.trace_stop"() : () -> ()
    %332 = vector.broadcast %23 : vector<1x1xf32> to vector<1x8xf32>
    %333 = arith.addf %331, %332 : vector<1x8xf32>
    %c0_85 = arith.constant 0 : index
    %c0_86 = arith.constant 0 : index
    %c48 = arith.constant 48 : index
    %334 = vector.load %arg11[%c0_85, %c0_86, %c48] : memref<1x1x64xf32, #tpu.memory_space<vmem>>, vector<1x1x8xf32>
    %335 = vector.shape_cast %334 : vector<1x1x8xf32> to vector<1x8xf32>
    %336 = vector.shape_cast %333 : vector<1x8xf32> to vector<1x1x8xf32>
    tpu.vector_store %arg11[%c0_85, %c0_86, %c48], %336 {strides = array<i32>} : memref<1x1x64xf32, #tpu.memory_space<vmem>>, vector<1x1x8xf32>,
    %cst_87 = arith.constant dense<0.000000e+00> : vector<8x128xf32>
    %337 = tpu.matmul %328, %14, %cst_87 {dimension_numbers = #tpu.dot_dimension_numbers<[1], [0], [0], [1], [0, 0, 1, 1], [], []>} : vector<8x32xf32>, vector<32x128xf32>, vector<8x128xf32> -> vector<8x128xf32>
    %338 = arith.addf %313, %337 : vector<8x128xf32>
    %339 = arith.mulf %338, %8 : vector<8x128xf32>
    %340 = math.tanh %339 : vector<8x128xf32>
    %341 = arith.mulf %340, %8 : vector<8x128xf32>
    %342 = arith.addf %341, %11 : vector<8x128xf32>
    %343 = vector.extract_strided_slice %342 {offsets = [0, 0], sizes = [8, 32], strides = [1, 1]} : vector<8x128xf32> to vector<8x32xf32>
    %344 = vector.extract_strided_slice %342 {offsets = [0, 32], sizes = [8, 32], strides = [1, 1]} : vector<8x128xf32> to vector<8x32xf32>
    %345 = vector.extract_strided_slice %342 {offsets = [0, 64], sizes = [8, 32], strides = [1, 1]} : vector<8x128xf32> to vector<8x32xf32>
    %346 = vector.extract_strided_slice %342 {offsets = [0, 96], sizes = [8, 32], strides = [1, 1]} : vector<8x128xf32> to vector<8x32xf32>
    %347 = arith.mulf %344, %326 : vector<8x32xf32>
    %348 = arith.mulf %343, %345 : vector<8x32xf32>
    %349 = arith.addf %347, %348 : vector<8x32xf32>
    %350 = math.tanh %349 : vector<8x32xf32>
    %351 = arith.mulf %346, %350 : vector<8x32xf32>
    %cst_88 = arith.constant 0.000000e+00 : f32
    %352 = vector.broadcast %cst_88 : f32 to vector<8x32xf32>
    %353 = arith.maximumf %351, %352 : vector<8x32xf32>
    "tpu.trace_start"() <{level = 10 : i32, message = "oh,bh->ob"}> : () -> ()
    %cst_89 = arith.constant dense<0.000000e+00> : vector<1x8xf32>
    %354 = tpu.matmul %22, %353, %cst_89 {dimension_numbers = #tpu.dot_dimension_numbers<[1], [1], [0], [0], [0, 0, 1, 0], [], []>} : vector<1x32xf32>, vector<8x32xf32>, vector<1x8xf32> -> vector<1x8xf32>
    "tpu.trace_stop"() : () -> ()
    %355 = vector.broadcast %23 : vector<1x1xf32> to vector<1x8xf32>
    %356 = arith.addf %354, %355 : vector<1x8xf32>
    %c0_90 = arith.constant 0 : index
    %c0_91 = arith.constant 0 : index
    %c56 = arith.constant 56 : index
    %357 = vector.load %arg11[%c0_90, %c0_91, %c56] : memref<1x1x64xf32, #tpu.memory_space<vmem>>, vector<1x1x8xf32>
    %358 = vector.shape_cast %357 : vector<1x1x8xf32> to vector<1x8xf32>
    %359 = vector.shape_cast %356 : vector<1x8xf32> to vector<1x1x8xf32>
    tpu.vector_store %arg11[%c0_90, %c0_91, %c56], %359 {strides = array<i32>} : memref<1x1x64xf32, #tpu.memory_space<vmem>>, vector<1x1x8xf32>,
    return
  }
  func.func @transform_0(%arg0: i32) -> (i32, i32, i32) {
    %c0_i32 = arith.constant 0 : i32
    %c0_i32_0 = arith.constant 0 : i32
    %c0_i32_1 = arith.constant 0 : i32
    return %arg0, %c0_i32, %c0_i32_0 : i32, i32, i32
  }
  func.func @transform_1(%arg0: i32) -> (i32, i32) {
    %c0_i32 = arith.constant 0 : i32
    %c0_i32_0 = arith.constant 0 : i32
    %c0_i32_1 = arith.constant 0 : i32
    return %c0_i32, %c0_i32_0 : i32, i32
  }
  func.func @transform_2(%arg0: i32) -> (i32, i32) {
    %c0_i32 = arith.constant 0 : i32
    %c0_i32_0 = arith.constant 0 : i32
    %c0_i32_1 = arith.constant 0 : i32
    return %c0_i32, %c0_i32_0 : i32, i32
  }
  func.func @transform_3(%arg0: i32) -> (i32, i32) {
    %c0_i32 = arith.constant 0 : i32
    %c0_i32_0 = arith.constant 0 : i32
    %c0_i32_1 = arith.constant 0 : i32
    return %c0_i32, %c0_i32_0 : i32, i32
  }
  func.func @transform_4(%arg0: i32) -> (i32, i32) {
    %c0_i32 = arith.constant 0 : i32
    %c0_i32_0 = arith.constant 0 : i32
    %c0_i32_1 = arith.constant 0 : i32
    return %c0_i32, %c0_i32_0 : i32, i32
  }
  func.func @transform_5(%arg0: i32) -> (i32, i32) {
    %c0_i32 = arith.constant 0 : i32
    %c0_i32_0 = arith.constant 0 : i32
    %c0_i32_1 = arith.constant 0 : i32
    return %c0_i32, %c0_i32_0 : i32, i32
  }
  func.func @transform_6(%arg0: i32) -> (i32, i32, i32, i32) {
    %c0_i32 = arith.constant 0 : i32
    %c0_i32_0 = arith.constant 0 : i32
    %c0_i32_1 = arith.constant 0 : i32
    %c0_i32_2 = arith.constant 0 : i32
    return %arg0, %c0_i32, %c0_i32_0, %c0_i32_1 : i32, i32, i32, i32
  }
  func.func @transform_7(%arg0: i32) -> (i32, i32, i32, i32) {
    %c0_i32 = arith.constant 0 : i32
    %c0_i32_0 = arith.constant 0 : i32
    %c0_i32_1 = arith.constant 0 : i32
    %c0_i32_2 = arith.constant 0 : i32
    return %arg0, %c0_i32, %c0_i32_0, %c0_i32_1 : i32, i32, i32, i32
  }
  func.func @transform_8(%arg0: i32) -> (i32, i32) {
    %c0_i32 = arith.constant 0 : i32
    %c0_i32_0 = arith.constant 0 : i32
    %c0_i32_1 = arith.constant 0 : i32
    return %c0_i32, %c0_i32_0 : i32, i32
  }
  func.func @transform_9(%arg0: i32) -> (i32, i32) {
    %c0_i32 = arith.constant 0 : i32
    %c0_i32_0 = arith.constant 0 : i32
    %c0_i32_1 = arith.constant 0 : i32
    return %c0_i32, %c0_i32_0 : i32, i32
  }
  func.func @transform_10(%arg0: i32) -> (i32, i32, i32) {
    %c0_i32 = arith.constant 0 : i32
    %c0_i32_0 = arith.constant 0 : i32
    %c0_i32_1 = arith.constant 0 : i32
    return %arg0, %c0_i32, %c0_i32_0 : i32, i32, i32
  }
}

</mosaic_0001>

<bundles_post_ra>
// kernel: tpu_custom_call.1
= control target key start
LH: loop header
LB: loop body
LE: loop exit
PB: predicated region body
PF: predicated region fallthrough
CT: control target
= control target key end

     0   :  { %s5167_s0 = inlined_call_operand.vmem [shape: f32[2,64,15], index: 0, kind: input, shape index: {}]   ;;  %s5168_s1 = inlined_call_operand.hbm [shape: f32[15,128], index: 1, kind: input, shape index: {}]   ;;  %s5169_s2 = inlined_call_operand.vmem [shape: f32[32,128], index: 2, kind: input, shape index: {}]   ;;  %s5170_s3 = inlined_call_operand.vmem [shape: f32[32,128], index: 3, kind: input, shape index: {}]   ;;  %s5171_s4 = inlined_call_operand.vmem [shape: f32[32,128], index: 4, kind: input, shape index: {}]   ;;  %s5172_s5 = inlined_call_operand.vmem [shape: f32[1,128], index: 5, kind: input, shape index: {}]   ;;  %s5173_s6 = inlined_call_operand.vmem [shape: f32[2,2,8,32], index: 6, kind: input, shape index: {}]   ;;  %s5174_s7 = inlined_call_operand.vmem [shape: f32[2,2,8,32], index: 7, kind: input, shape index: {}]   ;;  %s5175_s8 = inlined_call_operand.vmem [shape: f32[1,32], index: 8, kind: input, shape index: {}]   ;;  %s5176_s9 = inlined_call_operand.<no memory space> [shape: f32[1,1], index: 9, kind: input, shape index: {}]   ;;  %s5177_s10 = inlined_call_operand.hbm [shape: f32[2,1,64], index: 10, kind: output, shape index: {}]  }
   0x1   :  { %v15_v0 = vstv %s5176_s9 }
   0x2   :  { %16 = vst [vmem:[#allocation2] sm:$0x1] %v15_v0 }
   0x3   :  { %17 = vsyncpa [#allocation4], 0 }
   0x4   :  { %18 = vsyncpa [#allocation5], 0 }
   0x5   :  { %20 = vsyncpa [#allocation5 + $0x1], 0  ;;  %s4496_s15 = smov 0   ;;  %s4498_s16 = smov 0  }
   0x6   :  { %s4500_s17 = smov 0   ;;  %s4502_s18 = smov 0  }
   0x7 LB: > { %s4517_s9 = sadd.s32 4294967295, %s4418_s18   ;;  %s3482_s19 = sadd.s32 4294967294, %s4418_s18   ;;  %s4418_s18 = sphi %s4502_s18, %s5193_s18   ;;  %s4414_s17 = sphi %s4500_s17, %s5192_s17   ;;  %s4410_s16 = sphi %s4498_s16, %s5191_s16   ;;  %s4406_s15 = sphi %s4496_s15, %s5190_s15  }
   0x8   : > { %s4521_s20 = sadd.s32 1, %s4418_s18   ;;  %s258_s21 = sadd.s32 1, %s4414_s17 }
   0x9   : > { %s255_s22 = ssub.s32 %s4418_s18, %s4521_s20  ;;  %p268_p0 = scmp.ne.s32.totalorder %s4414_s17, %s4410_s16 }
   0xa   : > { %p256_p1 = scmp.eq.s32.totalorder %s255_s22, 0  ;;  %p269_p2 = scmp.eq.s32.totalorder %s4517_s9, 1 }
   0xb   : > { %p274_p3 = scmp.ne.s32.totalorder %s4410_s16, %s4406_s15  ;;  %p275_p4 = scmp.eq.s32.totalorder %s3482_s19, 1 }
   0xc   : > { %s4532_s23 = scalar_select %p256_p1, %s4414_s17, %s258_s21  }
   0xd   : > { %p4534_p5 = por %p269_p2, %p268_p0  ;;  %p4538_p6 = por %p275_p4, %p274_p3 }
   0xe   : > { %p3483_p7 = scmp.ge.s32.totalorder %s4418_s18, 1  ;;  %p282_p8 = scmp.lt.s32.totalorder %s4418_s18, 3 }
   0xf   : > { %s5181_s24 = scalar_select %p4534_p5, 1, 0 }
  0x10   : > { %s5182_s25 = scalar_select %p4538_p6, 1, 0 }
  0x11   : > { %p5178_p9 = scmp.eq.s32.totalorder %s4517_s9, 0  ;;  %p4545_p10 = pnand %p3483_p7, %p282_p8 }
  0x12   : > { %s4420_s27 = smov [#allocation3]   ;;  %s4324_s12 = scalar_lea.hbm %s5168_s1, 256 }
  0x13   : > { %s5183_s26 = scalar_select %p4545_p10, 1, 0 }
  0x14   : > { %s294_s28 = sshll.u32 %s4420_s27, 4  ;;  %p4198_p11 = pneg %p4545_p10  ;;  %s295_s28 = int_to_ptr.vmem [resolvable:$true] %s294_s28 }
  0x15   : > { %p4325_p13 = scmp.ne.s32.totalorder %s5168_s1, %s4324_s12  ;;  %p4331_p3 = scmp.lt.u32.totalorder %s4324_s12, %s5168_s1 }
  0x16   : > { %p4553_p12 = pnand %p5178_p9, %p4198_p11 }
  0x18   : > { %p4326_p0 = pneg %p4553_p12 }
  0x1a   : > { %p4327_p1 = pnand %p4326_p0, %p4325_p13 }
  0x1c   : > { %p4328_p2 = pneg %p4327_p1 }
  0x1e   : > { %p4333_p4 = pnand %p4331_p3, %p4328_p2 }
  0x20   : > { %4336 = shalt.err (!%p4333_p4)
}
  0x21   : > { %s4337_s22 = scalar_lea.vmem %s295_s28, 256  ;;  %p4345_p9 = scmp.lt.s32.totalorder %s295_s28, %s295_s28 }
  0x22   : > { %p4338_p7 = scmp.ne.s32.totalorder %s295_s28, %s4337_s22  ;;  %p4346_p6 = scmp.lt.s32.totalorder %s4337_s22, %s4337_s22 }
  0x24   : > { %p4340_p8 = pnand %p4338_p7, %p4326_p0  ;;  %p4347_p5 = por %p4346_p6, %p4345_p9 }
  0x26   : > { %p4341_p11 = pneg %p4340_p8 }
  0x28   : > { %p4348_p10 = pnand %p4347_p5, %p4341_p11 }
  0x2a   : > { %4351 = shalt.err (!%p4348_p10)
}
  0x2b   : > { %s4421_s27 = smov 128   ;;  %s4422_s30 = smov 8  }
  0x2c   : > { %4201 = dma.hbm_to_vmem [thread:$0]  (!%p4553_p12), %s5168_s1, 256, %s295_s28, [#allocation4], %s4421_s27, %s4421_s27, %s4422_s30  }
  0x2d   : > { %p5185_p13 = scmp.ne.s32.totalorder %s5183_s26, 0 }
  0x2e   : > { %p5186_p1 = scmp.eq.s32.totalorder (!%p5185_p13), %s4517_s9, 0 }
  0x2f   : > { %352 = sbr.rel (%p5185_p13) target bundleno = 10431 (0x28bf), region = 60 }
  0x36   : > { %4397 = dma.done.wait (%p5186_p1), [#allocation4], 256   ;;  %p5187_p0 = pmov %p5186_p1 }
  0x37   : > { %p399_p5 = scmp.lt.s32.totalorder %s4517_s9, 1  ;;  %v4423_v1 = vmov 0.0|0.0   ;;  %vm4424_vm0 = vmmov 0   ;;  %v4425_v2 = vmov 0.0   ;;  %vm468_vm1 = vcmask 1046528   ;;  %v441_v3 = vld [vmem:[#allocation3] sm:$0xff] }
  0x38   : > { %4399 = vsyncadd (%p5187_p0), [#allocation4], 4294967040  ;;  %4030 = vmatprep.subr.bf16.mxu1 %v4423_v1  ;;  %3733 = vmatprep.mubr.msk.f32.mxu1 %vm4424_vm0, %v4425_v2  ;;  %vm443_vm2 = vcmask 121856   ;;  %vm4426_vm3 = vmmov 1   ;;  %v442_v4 = vld [vmem:[#allocation3 + $0x8] sm:$0x7f]  ;;  %v414_v23 = vlaneseq }
  0x39   : > { %s4581_s12 = scalar_select %p399_p5, %s4517_s9, 1  ;;  %vm4019_vm4 = vmpackc.low %vm468_vm1, %vm4426_vm3  ;;  %v4018_v6 = vpack.c.bf16 %v442_v4, %v441_v3  ;;  %v421_v7 = vld [vmem:[%s5169_s2] sm:$0xff]  ;;  %v422_v8 = vld [vmem:[%s5169_s2 + $0x8] sm:$0xff]  ;;  %vm592_vm5 = vcmask 261120   ;;  %v4427_v31 = vmov 0.5   ;;  %vm1121_vm9 = vcmask 57344  }
  0x3a   : > { %v4601_v10 = vpack.c.bf16 %v422_v8, %v421_v7  ;;  %v423_v12 = vld [vmem:[%s5169_s2 + $0x10] sm:$0xff]  ;;  %v424_v13 = vld [vmem:[%s5169_s2 + $0x18] sm:$0xff]  ;;  %v415_v26 = vand.u32 127, %v414_v23  ;;  %s4428_s30 = smov 64   ;;  %s4429_s11 = smov 32   ;;  %v425_v48 = vld [vmem:[%s5170_s3] sm:$0xff] }
  0x3b   : > { %s3549_s26 = sshll.u32 %s4581_s12, 6  ;;  %4020 = vmatprep.subr.msk.bf16.mxu0 %vm4019_vm4, %v4018_v6  ;;  %v4615_v15 = vpack.c.bf16 %v424_v13, %v423_v12  ;;  %s3550_s28 = sshll.u32 %s4581_s12, 4  ;;  %v426_v49 = vld [vmem:[%s5170_s3 + $0x8] sm:$0xff]  ;;  %v427_v50 = vld [vmem:[%s5170_s3 + $0x10] sm:$0xff]  ;;  %v428_v52 = vld [vmem:[%s5170_s3 + $0x18] sm:$0xff]  ;;  %vm1467_vm10 = vcmask 122944  }
  0x3c   : > { %s4590_s14 = scalar_lea.vmem %s5167_s0, %s3549_s26  ;;  %4023 = vmatpush3.bf16.msk.msra.mxu0 %vm4019_vm4, %v4018_v6  ;;  %s4634_s21 = scalar_lea.vmem %s5173_s6, %s3550_s28  ;;  %vm416_vm6 = vcmp.ge.s32.totalorder %v415_v26, 64  ;;  %vm417_vm7 = vcmp.lt.s32.totalorder %v415_v26, 96  ;;  %v4689_v51 = vpack.c.bf16 %v426_v49, %v425_v48  ;;  %v4695_v53 = vpack.c.bf16 %v428_v52, %v427_v50  ;;  %v429_v13 = vld [vmem:[%s5171_s4] sm:$0xff] }
  0x3d   : > { %v433_v5 = vld [vmem:[%s4590_s14] sm:$0xff]  ;;  %v434_v9 = vld [vmem:[%s4590_s14 + $0x8] sm:$0xff]  ;;  %4024 = vmatprep.subr.bf16.mxu0 %v4423_v1  ;;  %v435_v11 = vld [vmem:[%s4590_s14 + $0x10] sm:$0xff]  ;;  %s4674_s27 = scalar_lea.vmem %s5174_s7, %s3550_s28  ;;  %s397_s26 = sand.u32 1, %s4410_s16   ;;  %vm1813_vm11 = vcmask 188544   ;;  %vm2159_vm12 = vcmask 254144  }
  0x3e   : > { %3702 = vmatprep.mubr.msk.f32.mxu0 %vm443_vm2, %v433_v5  ;;  %v436_v14 = vld [vmem:[%s4590_s14 + $0x18] sm:$0xff]  ;;  %v437_v16 = vld [vmem:[%s4590_s14 + $0x20] sm:$0xff]  ;;  %v438_v17 = vld [vmem:[%s4590_s14 + $0x28] sm:$0xff]  ;;  %4032 = vmatpush3.bf16.msra.mxu1 %v4689_v51  ;;  %s4431_s28 = smov 16   ;;  %s5099_s29 = scalar_lea.vmem [#allocation6], %s397_s26  ;;  %vm2505_vm13 = vcmask 319744  }
  0x3f   : > { %3703 = vmatmul.mubr.msk.f32.vlgmr.msra.gmra.mrb[0].mxu0 %vm443_vm2, %v434_v9  ;;  %v439_v18 = vld [vmem:[%s4590_s14 + $0x30] sm:$0xff]  ;;  %v440_v19 = vld [vmem:[%s4590_s14 + $0x38] sm:$0xff]  ;;  %v586_v20 = vld [vmem:[%s4634_s21] sm:$0xff]  ;;  %4033 = vmatprep.subr.bf16.mxu1 %v4423_v1  ;;  %s4433_s19 = smov 24   ;;  %s4434_s14 = smov 40   ;;  %vm2851_vm14 = vcmask 385344  }
  0x40   : > { %4026 = vmatpush3.bf16.msra.mxu0 %v4601_v10  ;;  %3705 = vmatprep.mubr.msk.f32.mxu0 %vm443_vm2, %v435_v11  ;;  %vm418_vm8 = vmand %vm416_vm6, %vm417_vm7  ;;  %v587_v41 = vld [vmem:[%s4674_s27] sm:$0xff]  ;;  %v3505_v12 = vld [vmem:[%s4674_s27 + $0x8] sm:$0xff]  ;;  %s4435_s22 = smov 48   ;;  %vm3197_vm15 = vcmask 450944   ;;  %s3546_s27 = sshll.u32 %s4517_s9, 4 }
  0x41   : > { %4027 = vmatprep.subr.bf16.mxu0 %v4423_v1  ;;  %v4662_v32 = vsel %vm418_vm8, 1.0, %v4427_v31  ;;  %v4665_v38 = vsel %vm418_vm8, 0.0, %v4427_v31  ;;  %v4776_v50 = vld [vmem:[%s5175_s8] sm:$0x1]  ;;  %s3391_s12 = sshll.u32 %s5099_s29, 4  ;;  %p5188_p9 = scmp.ne.s32.totalorder %s5181_s24, 0  ;;  %s5124_s12 = int_to_ptr.vmem [resolvable:$true] %s3391_s12 }
  0x42   : > { %4035 = vmatpush3.bf16.msra.mxu1 %v4695_v53  ;;  %s4437_s9 = smov [#allocation6]  }
  0x43   : > { %3706 = vmatmul.mubr.msk.f32.gmra.mrb[2].mxu0 %vm443_vm2, %v436_v14  ;;  %4042 = vmatprep.subr.bf16.mxu1 %v4423_v1  ;;  %v430_v14 = vld [vmem:[%s5171_s4 + $0x8] sm:$0xff] }
  0x44   : > { %3708 = vmatprep.mubr.msk.f32.mxu0 %vm443_vm2, %v437_v16  ;;  %4029 = vmatpush3.bf16.msra.mxu0 %v4615_v15  ;;  %v4731_v16 = vpack.c.bf16 %v430_v14, %v429_v13 }
  0x45   : > { %4036 = vmatprep.subr.bf16.mxu0 %v4423_v1 }
  0x47   : > { %3709 = vmatmul.mubr.msk.f32.gmra.mrb[4].mxu0 %vm443_vm2, %v438_v17  ;;  %v431_v17 = vld [vmem:[%s5171_s4 + $0x10] sm:$0xff] }
  0x48   : > { %3711 = vmatprep.mubr.msk.f32.mxu0 %vm443_vm2, %v439_v18  ;;  %v432_v18 = vld [vmem:[%s5171_s4 + $0x18] sm:$0xff] }
  0x4b   : > { %3712 = vmatmul.mubr.msk.f32.gmra.mrb[6].mxu0 %vm443_vm2, %v440_v19 }
  0x4c   : > { %3722 = vmatprep.mubr.msk.f32.mxu0 %vm4424_vm0, %v4425_v2 }
  0x4f   : > { %3723 = vmatmul.mubr.msk.f32.vlgmr.msra.gmra.mrb[8].mxu0 %vm592_vm5, %v586_v20  ;;  %v4741_v20 = vpack.c.bf16 %v432_v18, %v431_v17 }
  0x50   : > { %4038 = vmatpush3.bf16.msra.mxu0 %v4601_v10  ;;  %3744 = vmatprep.mubr.msk.f32.mxu0 %vm4424_vm0, %v4425_v2 }
  0x51   : > { %4039 = vmatprep.subr.bf16.mxu0 %v4423_v1 }
  0x54   : > { %4041 = vmatpush3.bf16.msra.mxu0 %v4615_v15 }
  0x55   : > { %3769 = vmatprep.subr.mxu0 %v4425_v2 }
 0x112   : > { %v4647_v21 = vpop.f32.mrb[0].mxu0 }
 0x113   : > { %v538_v22 = vpop.f32.mrb[1].mxu0 }
 0x116   : > { %v4649_v24 = vpop.f32.mrb[2].mxu0 }
 0x117   : > { %v4651_v25 = vpop.f32.mrb[3].mxu0 }
 0x11a   : > { %v4654_v27 = vpop.f32.mrb[4].mxu0 }
 0x11b   : > { %v4656_v28 = vpop.f32.mrb[5].mxu0 }
 0x11e   : > { %v4658_v29 = vpop.f32.mrb[6].mxu0 }
 0x11f   : > { %v4660_v30 = vpop.f32.mrb[7].mxu0 }
 0x122   : > { %v662_v33 = vpop.f32.mrb[8].mxu0 }
 0x123   : > { %v666_v34 = vadd.f32 %v662_v33, %v538_v22  ;;  %v3724_v35 = vpop.f32.mrb[9].mxu0  ;;  %v4759_v22 = vld [vmem:[%s5172_s5] ss:$0 sm:$0xff] }
 0x125   : > { %v667_v36 = vmul.f32 %v666_v34, %v4662_v32 }
 0x127   : > { %4260 = vtanh.f32 %v667_v36 }
 0x131   : > { %v4261_v37 = vpop.eup %4260 }
 0x132   : > { %v669_v39 = vmul.f32 %v4261_v37, %v4662_v32 }
 0x134   : > { %v670_v40 = vadd.f32 %v669_v39, %v4665_v38 }
 0x136   : > { %677 = vrot.lane.b32.xlu0 %v670_v40, %s4428_s30 }
 0x13a   : > { %672 = vrot.lane.b32.xlu0 %v587_v41, %s4429_s11 }
 0x1a8   : > { %v678_v42 = vpop.permute.xlu0 %677 }
 0x1a9   : > { %v680_v43 = vmul.f32 %v678_v42, %v670_v40 }
 0x1ab   : > { %682 = vrot.lane.b32.xlu1 %v680_v43, %s4429_s11 }
 0x1ac   : > { %v673_v44 = vpop.permute.xlu0 %672 }
 0x1ad   : > { %v675_v45 = vmul.f32 %v673_v44, %v670_v40 }
 0x21d   : > { %v683_v46 = vpop.permute.xlu1 %682 }
 0x21e   : > { %v685_v47 = vadd.f32 %v683_v46, %v675_v45 }
 0x220   : > { %4262 = vtanh.f32 %v685_v47 }
 0x22a   : > { %v4263_v54 = vpop.eup %4262 }
 0x22b   : > { %688 = vrot.lane.b32.xlu1 %v4263_v54, %s4428_s30 }
 0x29d   : > { %v689_v55 = vpop.permute.xlu1 %688 }
 0x29e   : > { %v691_v56 = vmul.f32 %v689_v55, %v670_v40 }
 0x2a0   : > { %693 = vrot.lane.b32.xlu0 %v691_v56, %s4429_s11 }
 0x312   : > { %v694_v57 = vpop.permute.xlu0 %693 }
 0x313   : > { %3734 = vmatmul.mubr.msk.f32.vlgmr.msra.gmra.mrb[0].mxu1 %vm592_vm5, %v694_v57  ;;  %3745 = vmatmul.mubr.msk.f32.vlgmr.msra.gmra.mrb[10].mxu0 %vm592_vm5, %v694_v57 }
 0x314   : > { %4044 = vmatpush3.bf16.msra.mxu1 %v4689_v51  ;;  %3755 = vmatprep.mubr.msk.f32.mxu1 %vm4424_vm0, %v4425_v2 }
 0x315   : > { %4045 = vmatprep.subr.bf16.mxu1 %v4423_v1  ;;  %3771 = vmatprep.mubr.msk.f32.mxu0 %vm4424_vm0, %v4425_v2 }
 0x318   : > { %4047 = vmatpush3.bf16.msra.mxu1 %v4695_v53 }
 0x319   : > { %4048 = vmatprep.subr.bf16.mxu1 %v4423_v1 }
 0x3e6   : > { %v833_v58 = vpop.f32.mrb[10].mxu0 }
 0x3e7   : > { %v837_v59 = vadd.f32 %v4647_v21, %v833_v58  ;;  %v3746_v60 = vpop.f32.mrb[11].mxu0  ;;  %v3504_v21 = vld [vmem:[%s4634_s21 + $0x8] sm:$0xff] }
 0x3e9   : > { %v838_v61 = vmul.f32 %v837_v59, %v4662_v32 }
 0x3eb   : > { %4264 = vtanh.f32 %v838_v61 }
 0x3f5   : > { %v4265_v62 = vpop.eup %4264 }
 0x3f6   : > { %v840_v63 = vmul.f32 %v4265_v62, %v4662_v32 }
 0x3f8   : > { %v841_v0 = vadd.f32 %v840_v63, %v4665_v38 }
 0x3fa   : > { %844 = vrot.lane.b32.xlu1 %v841_v0, %s4428_s30  ;;  %v842_v5 = vmul.f32 %v841_v0, %v685_v47 }
 0x46c   : > { %v845_v3 = vpop.permute.xlu1 %844 }
 0x46d   : > { %v847_v4 = vmul.f32 %v845_v3, %v841_v0 }
 0x46f   : > { %849 = vrot.lane.b32.xlu0 %v847_v4, %s4429_s11 }
 0x4e1   : > { %v850_v6 = vpop.permute.xlu0 %849 }
 0x4e2   : > { %v4718_v7 = vadd.f32 %v850_v6, %v842_v5 }
 0x4e4   : > { %4266 = vtanh.f32 %v4718_v7 }
 0x4ee   : > { %v4267_v8 = vpop.eup %4266 }
 0x4ef   : > { %855 = vrot.lane.b32.xlu1 %v4267_v8, %s4428_s30 }
 0x561   : > { %v856_v9 = vpop.permute.xlu1 %855 }
 0x562   : > { %v858_v11 = vmul.f32 %v856_v9, %v841_v0 }
 0x564   : > { %860 = vrot.lane.b32.xlu0 %v858_v11, %s4429_s11 }
 0x568   : > { %1013 = vrot.lane.b32.xlu0 %v3505_v12, %s4429_s11 }
 0x5d6   : > { %v861_v19 = vpop.permute.xlu0 %860 }
 0x5d7   : > { %3756 = vmatmul.mubr.msk.f32.vlgmr.msra.gmra.mrb[2].mxu1 %vm592_vm5, %v861_v19 }
 0x5d8   : > { %4050 = vmatpush3.bf16.msra.mxu1 %v4731_v16  ;;  %3766 = vmatprep.mubr.msk.f32.mxu1 %vm4424_vm0, %v4425_v2 }
 0x5d9   : > { %4051 = vmatprep.subr.bf16.mxu1 %v4423_v1 }
 0x5da   : > { %v1014_v41 = vpop.permute.xlu0 %1013 }
 0x5dc   : > { %4053 = vmatpush3.bf16.msra.mxu1 %v4741_v20 }
 0x5dd   : > { %4066 = vmatprep.subr.bf16.mxu1 %v4423_v1 }
 0x5df   : > { %3767 = vmatmul.mubr.msk.f32.vlgmr.msra.gmra.mrb[0].mxu1 %vm592_vm5, %v3504_v21 }
 0x5e0   : > { %4068 = vmatpush3.bf16.msra.mxu1 %v4731_v16  ;;  %3804 = vmatprep.mubr.msk.f32.mxu1 %vm4424_vm0, %v4425_v2 }
 0x5e1   : > { %4069 = vmatprep.subr.bf16.mxu1 %v4423_v1 }
 0x5e4   : > { %4071 = vmatpush3.bf16.msra.mxu1 %v4741_v20 }
 0x5e5   : > { %4072 = vmatprep.subr.bf16.mxu1 %v4423_v1 }
 0x6b2   : > { %v1003_v26 = vpop.f32.mrb[0].mxu1 }
 0x6b3   : > { %v4168_v31 = vadd.f32 %v4759_v22, %v1003_v26  ;;  %v3768_v33 = vpop.f32.mrb[1].mxu1 }
 0x6b5   : > { %v1008_v34 = vmul.f32 %v4168_v31, %v4662_v32 }
 0x6b7   : > { %4268 = vtanh.f32 %v1008_v34 }
 0x6c1   : > { %v4269_v35 = vpop.eup %4268 }
 0x6c2   : > { %v1010_v36 = vmul.f32 %v4269_v35, %v4662_v32 }
 0x6c4   : > { %v1011_v37 = vadd.f32 %v1010_v36, %v4665_v38 }
 0x6c6   : > { %1018 = vrot.lane.b32.xlu1 %v1011_v37, %s4428_s30  ;;  %v1016_v42 = vmul.f32 %v1014_v41, %v1011_v37 }
 0x738   : > { %v1019_v39 = vpop.permute.xlu1 %1018 }
 0x739   : > { %v1021_v40 = vmul.f32 %v1019_v39, %v1011_v37 }
 0x73b   : > { %1023 = vrot.lane.b32.xlu1 %v1021_v40, %s4429_s11 }
 0x7ad   : > { %v1024_v43 = vpop.permute.xlu1 %1023 }
 0x7ae   : > { %v4767_v44 = vadd.f32 %v1024_v43, %v1016_v42 }
 0x7b0   : > { %4270 = vtanh.f32 %v4767_v44 }
 0x7ba   : > { %v4271_v45 = vpop.eup %4270 }
 0x7bb   : > { %1029 = vrot.lane.b32.xlu0 %v4271_v45, %s4428_s30 }
 0x82d   : > { %v1030_v46 = vpop.permute.xlu0 %1029 }
 0x82e   : > { %v1032_v47 = vmul.f32 %v1030_v46, %v1011_v37 }
 0x830   : > { %v1033_v48 = vmax.f32 %v1032_v47, 0.0 }
 0x832   : > { %1044 = vrot.lane.b32.xlu1 %v1033_v48, %s4429_s11 }
 0x8a4   : > { %v1045_v49 = vpop.permute.xlu1 %1044 }
 0x8a5   : > { %3770 = vmatpush3.xpose.msk.msra.mxu0 %vm592_vm5, %v1045_v49 }
 0x8a6   : > { %4054 = vmatprep.subr.bf16.mxu0 %v4423_v1 }
 0x8a8   : > { %3772 = vmatmul.mubr.msk.f32.vlgmr.msra.gmra.mrb[12].mxu0 %vm592_vm5, %v4776_v50 }
 0x8a9   : > { %4056 = vmatpush3.bf16.msra.mxu0 %v4601_v10  ;;  %3782 = vmatprep.mubr.msk.f32.mxu0 %vm4424_vm0, %v4425_v2 }
 0x8aa   : > { %4057 = vmatprep.subr.bf16.mxu0 %v4423_v1 }
 0x8ad   : > { %4059 = vmatpush3.bf16.msra.mxu0 %v4615_v15 }
 0x8ae   : > { %4060 = vmatprep.subr.bf16.mxu0 %v4423_v1 }
 0x8b0   : > { %3783 = vmatmul.mubr.msk.f32.vlgmr.msra.gmra.mrb[14].mxu0 %vm592_vm5, %v861_v19 }
 0x8b1   : > { %4062 = vmatpush3.bf16.msra.mxu0 %v4689_v51  ;;  %3793 = vmatprep.mubr.msk.f32.mxu0 %vm4424_vm0, %v4425_v2 }
 0x8b2   : > { %4063 = vmatprep.subr.bf16.mxu0 %v4423_v1 }
 0x8b5   : > { %4065 = vmatpush3.bf16.msra.mxu0 %v4695_v53 }
 0x8b6   : > { %3807 = vmatprep.subr.mxu0 %v4425_v2 }
 0x97b   : > { %v4794_v52 = vpop.f32.mrb[12].mxu0 }
 0x97c   : > { %v3773_v54 = vpop.f32.mrb[13].mxu0 }
 0x983   : > { %v1189_v55 = vpop.f32.mrb[14].mxu0 }
 0x984   : > { %v1193_v56 = vadd.f32 %v1189_v55, %v4651_v25  ;;  %v3784_v57 = vpop.f32.mrb[15].mxu0 }
 0x986   : > { %v1194_v58 = vmul.f32 %v1193_v56, %v4662_v32 }
 0x988   : > { %4272 = vtanh.f32 %v1194_v58 }
 0x992   : > { %v4273_v59 = vpop.eup %4272 }
 0x993   : > { %v1196_v60 = vmul.f32 %v4273_v59, %v4662_v32 }
 0x995   : > { %v1197_v61 = vadd.f32 %v1196_v60, %v4665_v38 }
 0x997   : > { %1200 = vrot.lane.b32.xlu0 %v1197_v61, %s4428_s30  ;;  %v1198_v0 = vmul.f32 %v1197_v61, %v4718_v7 }
 0xa09   : > { %v1201_v62 = vpop.permute.xlu0 %1200 }
 0xa0a   : > { %v1203_v63 = vmul.f32 %v1201_v62, %v1197_v61 }
 0xa0c   : > { %1205 = vrot.lane.b32.xlu1 %v1203_v63, %s4429_s11 }
 0xa10   : > { %1291 = vrot.lane.b32.xlu1 %v1032_v47, %s4429_s11 }
 0xa7e   : > { %v1206_v25 = vpop.permute.xlu1 %1205 }
 0xa7f   : > { %v1208_v3 = vadd.f32 %v1206_v25, %v1198_v0 }
 0xa81   : > { %4274 = vtanh.f32 %v1208_v3 }
 0xa82   : > { %v1292_v4 = vpop.permute.xlu1 %1291 }
 0xa83   : > { %3805 = vmatmul.mubr.msk.f32.vlgmr.msra.gmra.mrb[2].mxu1 %vm592_vm5, %v1292_v4 }
 0xa84   : > { %4074 = vmatpush3.bf16.msra.mxu1 %v4601_v10  ;;  %3820 = vmatprep.mubr.msk.f32.mxu1 %vm4424_vm0, %v4425_v2 }
 0xa85   : > { %4075 = vmatprep.subr.bf16.mxu1 %v4423_v1 }
 0xa88   : > { %4077 = vmatpush3.bf16.msra.mxu1 %v4615_v15 }
 0xa89   : > { %3845 = vmatprep.subr.mxu1 %v4425_v2 }
 0xa8b   : > { %v4275_v5 = vpop.eup %4274 }
 0xa8c   : > { %1211 = vrot.lane.b32.xlu0 %v4275_v5, %s4428_s30 }
 0xafe   : > { %v1212_v6 = vpop.permute.xlu0 %1211 }
 0xaff   : > { %v1214_v7 = vmul.f32 %v1212_v6, %v1197_v61 }
 0xb01   : > { %1216 = vrot.lane.b32.xlu0 %v1214_v7, %s4429_s11 }
 0xb56   : > { %v1361_v8 = vpop.f32.mrb[2].mxu1 }
 0xb57   : > { %v4169_v9 = vadd.f32 %v4759_v22, %v1361_v8  ;;  %v3806_v11 = vpop.f32.mrb[3].mxu1 }
 0xb59   : > { %v1366_v12 = vmul.f32 %v4169_v9, %v4662_v32 }
 0xb5b   : > { %4276 = vtanh.f32 %v1366_v12 }
 0xb65   : > { %v4277_v13 = vpop.eup %4276 }
 0xb66   : > { %v1368_v14 = vmul.f32 %v4277_v13, %v4662_v32 }
 0xb68   : > { %v1369_v17 = vadd.f32 %v1368_v14, %v4665_v38 }
 0xb6a   : > { %1372 = vrot.lane.b32.xlu1 %v1369_v17, %s4428_s30  ;;  %v1370_v35 = vmul.f32 %v1369_v17, %v4767_v44 }
 0xb73   : > { %v1217_v18 = vpop.permute.xlu0 %1216 }
 0xb74   : > { %3794 = vmatmul.mubr.msk.f32.vlgmr.msra.gmra.mrb[16].mxu0 %vm592_vm5, %v1217_v18  ;;  %3821 = vmatmul.mubr.msk.f32.vlgmr.msra.gmra.mrb[4].mxu1 %vm592_vm5, %v1217_v18 }
 0xb75   : > { %3809 = vmatprep.mubr.msk.f32.mxu0 %vm4424_vm0, %v4425_v2  ;;  %3847 = vmatprep.mubr.msk.f32.mxu1 %vm4424_vm0, %v4425_v2 }
 0xbdc   : > { %v1373_v19 = vpop.permute.xlu1 %1372 }
 0xbdd   : > { %v1375_v21 = vmul.f32 %v1373_v19, %v1369_v17 }
 0xbdf   : > { %1377 = vrot.lane.b32.xlu1 %v1375_v21, %s4429_s11 }
 0xc47   : > { %v1535_v26 = vpop.f32.mrb[4].mxu1 }
 0xc48   : > { %v1539_v31 = vadd.f32 %v4649_v24, %v1535_v26  ;;  %v3822_v33 = vpop.f32.mrb[5].mxu1 }
 0xc4a   : > { %v1540_v34 = vmul.f32 %v1539_v31, %v4662_v32 }
 0xc4c   : > { %4278 = vtanh.f32 %v1540_v34 }
 0xc51   : > { %v1378_v36 = vpop.permute.xlu1 %1377 }
 0xc52   : > { %v1380_v37 = vadd.f32 %v1378_v36, %v1370_v35 }
 0xc54   : > { %4280 = vtanh.f32 %v1380_v37 }
 0xc56   : > { %v4279_v39 = vpop.eup %4278 }
 0xc57   : > { %v1542_v40 = vmul.f32 %v4279_v39, %v4662_v32 }
 0xc59   : > { %v1543_v41 = vadd.f32 %v1542_v40, %v4665_v38 }
 0xc5b   : > { %1546 = vrot.lane.b32.xlu0 %v1543_v41, %s4428_s30  ;;  %v1544_v47 = vmul.f32 %v1543_v41, %v1208_v3 }
 0xc5e   : > { %v4281_v42 = vpop.eup %4280 }
 0xc5f   : > { %1383 = vrot.lane.b32.xlu1 %v4281_v42, %s4428_s30 }
 0xccd   : > { %v1547_v24 = vpop.permute.xlu0 %1546 }
 0xcce   : > { %v1549_v43 = vmul.f32 %v1547_v24, %v1543_v41 }
 0xcd0   : > { %1551 = vrot.lane.b32.xlu0 %v1549_v43, %s4429_s11 }
 0xcd1   : > { %v1384_v45 = vpop.permute.xlu1 %1383 }
 0xcd2   : > { %v1386_v46 = vmul.f32 %v1384_v45, %v1369_v17 }
 0xcd4   : > { %v1387_v44 = vmax.f32 %v1386_v46, 0.0 }
 0xcd6   : > { %1389 = vrot.lane.b32.xlu1 %v1387_v44, %s4429_s11 }
 0xcda   : > { %1637 = vrot.lane.b32.xlu1 %v1386_v46, %s4429_s11 }
 0xd42   : > { %v1552_v48 = vpop.permute.xlu0 %1551 }
 0xd43   : > { %v4835_v49 = vadd.f32 %v1552_v48, %v1544_v47 }
 0xd45   : > { %4282 = vtanh.f32 %v4835_v49 }
 0xd48   : > { %v1390_v54 = vpop.permute.xlu1 %1389 }
 0xd49   : > { %3808 = vmatpush3.xpose.msk.msra.mxu0 %vm592_vm5, %v1390_v54 }
 0xd4a   : > { %4078 = vmatprep.subr.bf16.mxu0 %v4423_v1 }
 0xd4c   : > { %3810 = vmatmul.mubr.msk.f32.vlgmr.msra.gmra.mrb[18].mxu0 %vm592_vm5, %v4776_v50  ;;  %v1638_v61 = vpop.permute.xlu1 %1637 }
 0xd4d   : > { %4080 = vmatpush3.bf16.msra.mxu0 %v4689_v51  ;;  %3831 = vmatprep.mubr.msk.f32.mxu0 %vm4424_vm0, %v4425_v2 }
 0xd4e   : > { %4081 = vmatprep.subr.bf16.mxu0 %v4423_v1 }
 0xd4f   : > { %v4283_v55 = vpop.eup %4282 }
 0xd50   : > { %1557 = vrot.lane.b32.xlu0 %v4283_v55, %s4428_s30 }
 0xd51   : > { %4083 = vmatpush3.bf16.msra.mxu0 %v4695_v53 }
 0xd52   : > { %4084 = vmatprep.subr.bf16.mxu0 %v4423_v1 }
 0xdc2   : > { %v1558_v56 = vpop.permute.xlu0 %1557 }
 0xdc3   : > { %v1560_v57 = vmul.f32 %v1558_v56, %v1543_v41 }
 0xdc5   : > { %1562 = vrot.lane.b32.xlu0 %v1560_v57, %s4429_s11 }
 0xe1f   : > { %v4850_v58 = vpop.f32.mrb[18].mxu0 }
 0xe20   : > { %v3811_v59 = vpop.f32.mrb[19].mxu0 }
 0xe37   : > { %v1563_v60 = vpop.permute.xlu0 %1562 }
 0xe38   : > { %3832 = vmatmul.mubr.msk.f32.vlgmr.msra.gmra.mrb[20].mxu0 %vm592_vm5, %v1563_v60 }
 0xe39   : > { %4086 = vmatpush3.bf16.msra.mxu0 %v4731_v16  ;;  %3842 = vmatprep.mubr.msk.f32.mxu0 %vm4424_vm0, %v4425_v2 }
 0xe3a   : > { %4087 = vmatprep.subr.bf16.mxu0 %v4423_v1 }
 0xe3d   : > { %4089 = vmatpush3.bf16.msra.mxu0 %v4741_v20 }
 0xe3e   : > { %4096 = vmatprep.subr.bf16.mxu0 %v4423_v1 }
 0xe40   : > { %3843 = vmatmul.mubr.msk.f32.vlgmr.msra.gmra.mrb[16].mxu0 %vm592_vm5, %v1638_v61 }
 0xe41   : > { %4098 = vmatpush3.bf16.msra.mxu0 %v4689_v51  ;;  %3869 = vmatprep.mubr.msk.f32.mxu0 %vm4424_vm0, %v4425_v2 }
 0xe42   : > { %4099 = vmatprep.subr.bf16.mxu0 %v4423_v1 }
 0xe45   : > { %4101 = vmatpush3.bf16.msra.mxu0 %v4695_v53 }
 0xe46   : > { %4102 = vmatprep.subr.bf16.mxu0 %v4423_v1 }
 0xf13   : > { %v1707_v62 = vpop.f32.mrb[16].mxu0 }
 0xf14   : > { %v4170_v63 = vadd.f32 %v4759_v22, %v1707_v62  ;;  %v3844_v0 = vpop.f32.mrb[17].mxu0 }
 0xf16   : > { %v1712_v25 = vmul.f32 %v4170_v63, %v4662_v32 }
 0xf18   : > { %4284 = vtanh.f32 %v1712_v25 }
 0xf22   : > { %v4285_v3 = vpop.eup %4284 }
 0xf23   : > { %v1714_v4 = vmul.f32 %v4285_v3, %v4662_v32 }
 0xf25   : > { %v1715_v5 = vadd.f32 %v1714_v4, %v4665_v38 }
 0xf27   : > { %1718 = vrot.lane.b32.xlu0 %v1715_v5, %s4428_s30  ;;  %v1716_v8 = vmul.f32 %v1715_v5, %v1380_v37 }
 0xf99   : > { %v1719_v6 = vpop.permute.xlu0 %1718 }
 0xf9a   : > { %v1721_v7 = vmul.f32 %v1719_v6, %v1715_v5 }
 0xf9c   : > { %1723 = vrot.lane.b32.xlu1 %v1721_v7, %s4429_s11 }
0x100e   : > { %v1724_v9 = vpop.permute.xlu1 %1723 }
0x100f   : > { %v4872_v11 = vadd.f32 %v1724_v9, %v1716_v8 }
0x1011   : > { %4286 = vtanh.f32 %v4872_v11 }
0x101b   : > { %v4287_v12 = vpop.eup %4286 }
0x101c   : > { %1729 = vrot.lane.b32.xlu0 %v4287_v12, %s4428_s30 }
0x108e   : > { %v1730_v13 = vpop.permute.xlu0 %1729 }
0x108f   : > { %v1732_v14 = vmul.f32 %v1730_v13, %v1715_v5 }
0x1091   : > { %v1733_v17 = vmax.f32 %v1732_v14, 0.0 }
0x1093   : > { %1735 = vrot.lane.b32.xlu1 %v1733_v17, %s4429_s11 }
0x1105   : > { %v1736_v18 = vpop.permute.xlu1 %1735 }
0x1106   : > { %3846 = vmatpush3.xpose.msk.msra.mxu1 %vm592_vm5, %v1736_v18 }
0x1107   : > { %4090 = vmatprep.subr.bf16.mxu1 %v4423_v1 }
0x1109   : > { %3848 = vmatmul.mubr.msk.f32.vlgmr.msra.gmra.mrb[6].mxu1 %vm592_vm5, %v4776_v50 }
0x110a   : > { %4092 = vmatpush3.bf16.msra.mxu1 %v4601_v10  ;;  %3858 = vmatprep.mubr.msk.f32.mxu1 %vm4424_vm0, %v4425_v2 }
0x110b   : > { %4093 = vmatprep.subr.bf16.mxu1 %v4423_v1 }
0x110e   : > { %4095 = vmatpush3.bf16.msra.mxu1 %v4615_v15 }
0x110f   : > { %3883 = vmatprep.subr.mxu1 %v4425_v2 }
0x1111   : > { %3859 = vmatmul.mubr.msk.f32.vlgmr.msra.gmra.mrb[8].mxu1 %vm592_vm5, %v1563_v60 }
0x1112   : > { %3885 = vmatprep.mubr.msk.f32.mxu1 %vm4424_vm0, %v4425_v2 }
0x11dc   : > { %v4890_v19 = vpop.f32.mrb[6].mxu1 }
0x11dd   : > { %v3849_v21 = vpop.f32.mrb[7].mxu1 }
0x11e4   : > { %v1881_v26 = vpop.f32.mrb[8].mxu1 }
0x11e5   : > { %v1885_v31 = vadd.f32 %v1881_v26, %v4656_v28  ;;  %v3860_v33 = vpop.f32.mrb[9].mxu1 }
0x11e7   : > { %v1886_v34 = vmul.f32 %v1885_v31, %v4662_v32 }
0x11e9   : > { %4288 = vtanh.f32 %v1886_v34 }
0x11f3   : > { %v4289_v35 = vpop.eup %4288 }
0x11f4   : > { %v1888_v36 = vmul.f32 %v4289_v35, %v4662_v32 }
0x11f6   : > { %v1889_v37 = vadd.f32 %v1888_v36, %v4665_v38 }
0x11f8   : > { %1892 = vrot.lane.b32.xlu0 %v1889_v37, %s4428_s30  ;;  %v1890_v41 = vmul.f32 %v1889_v37, %v4835_v49 }
0x126a   : > { %v1893_v39 = vpop.permute.xlu0 %1892 }
0x126b   : > { %v1895_v40 = vmul.f32 %v1893_v39, %v1889_v37 }
0x126d   : > { %1897 = vrot.lane.b32.xlu1 %v1895_v40, %s4429_s11 }
0x12df   : > { %v1898_v42 = vpop.permute.xlu1 %1897 }
0x12e0   : > { %v4899_v24 = vadd.f32 %v1898_v42, %v1890_v41 }
0x12e2   : > { %4290 = vtanh.f32 %v4899_v24 }
0x12ec   : > { %v4291_v28 = vpop.eup %4290 }
0x12ed   : > { %1903 = vrot.lane.b32.xlu0 %v4291_v28, %s4428_s30 }
0x12f1   : > { %1983 = vrot.lane.b32.xlu0 %v1732_v14, %s4429_s11 }
0x135f   : > { %v1904_v43 = vpop.permute.xlu0 %1903 }
0x1360   : > { %v1906_v45 = vmul.f32 %v1904_v43, %v1889_v37 }
0x1362   : > { %1908 = vrot.lane.b32.xlu1 %v1906_v45, %s4429_s11 }
0x1363   : > { %v1984_v44 = vpop.permute.xlu0 %1983 }
0x13d4   : > { %v1909_v46 = vpop.permute.xlu1 %1908 }
0x13d5   : > { %3870 = vmatmul.mubr.msk.f32.vlgmr.msra.gmra.mrb[22].mxu0 %vm592_vm5, %v1909_v46 }
0x13d6   : > { %4104 = vmatpush3.bf16.msra.mxu0 %v4731_v16  ;;  %3880 = vmatprep.mubr.msk.f32.mxu0 %vm4424_vm0, %v4425_v2 }
0x13d7   : > { %4105 = vmatprep.subr.bf16.mxu0 %v4423_v1 }
0x13da   : > { %4107 = vmatpush3.bf16.msra.mxu0 %v4741_v20 }
0x13db   : > { %4120 = vmatprep.subr.bf16.mxu0 %v4423_v1 }
0x13dd   : > { %3881 = vmatmul.mubr.msk.f32.vlgmr.msra.gmra.mrb[20].mxu0 %vm592_vm5, %v1984_v44 }
0x13de   : > { %4122 = vmatpush3.bf16.msra.mxu0 %v4731_v16  ;;  %3918 = vmatprep.mubr.msk.f32.mxu0 %vm4424_vm0, %v4425_v2 }
0x13df   : > { %4123 = vmatprep.subr.bf16.mxu0 %v4423_v1 }
0x13e2   : > { %4125 = vmatpush3.bf16.msra.mxu0 %v4741_v20 }
0x13e3   : > { %4126 = vmatprep.subr.bf16.mxu0 %v4423_v1 }
0x14b0   : > { %v2053_v47 = vpop.f32.mrb[20].mxu0 }
0x14b1   : > { %v4171_v48 = vadd.f32 %v4759_v22, %v2053_v47  ;;  %v3882_v49 = vpop.f32.mrb[21].mxu0 }
0x14b3   : > { %v2058_v54 = vmul.f32 %v4171_v48, %v4662_v32 }
0x14b5   : > { %4292 = vtanh.f32 %v2058_v54 }
0x14bf   : > { %v4293_v55 = vpop.eup %4292 }
0x14c0   : > { %v2060_v56 = vmul.f32 %v4293_v55, %v4662_v32 }
0x14c2   : > { %v2061_v57 = vadd.f32 %v2060_v56, %v4665_v38 }
0x14c4   : > { %2064 = vrot.lane.b32.xlu1 %v2061_v57, %s4428_s30  ;;  %v2062_v61 = vmul.f32 %v2061_v57, %v4872_v11 }
0x1536   : > { %v2065_v59 = vpop.permute.xlu1 %2064 }
0x1537   : > { %v2067_v60 = vmul.f32 %v2065_v59, %v2061_v57 }
0x1539   : > { %2069 = vrot.lane.b32.xlu0 %v2067_v60, %s4429_s11 }
0x15ab   : > { %v2070_v62 = vpop.permute.xlu0 %2069 }
0x15ac   : > { %v4926_v63 = vadd.f32 %v2070_v62, %v2062_v61 }
0x15ae   : > { %4294 = vtanh.f32 %v4926_v63 }
0x15b8   : > { %v4295_v0 = vpop.eup %4294 }
0x15b9   : > { %2075 = vrot.lane.b32.xlu1 %v4295_v0, %s4428_s30 }
0x162b   : > { %v2076_v25 = vpop.permute.xlu1 %2075 }
0x162c   : > { %v2078_v3 = vmul.f32 %v2076_v25, %v2061_v57 }
0x162e   : > { %v2079_v4 = vmax.f32 %v2078_v3, 0.0 }
0x1630   : > { %2081 = vrot.lane.b32.xlu0 %v2079_v4, %s4429_s11 }
0x16a2   : > { %v2082_v5 = vpop.permute.xlu0 %2081 }
0x16a3   : > { %3884 = vmatpush3.xpose.msk.msra.mxu1 %vm592_vm5, %v2082_v5 }
0x16a4   : > { %4108 = vmatprep.subr.bf16.mxu1 %v4423_v1 }
0x16a6   : > { %3886 = vmatmul.mubr.msk.f32.vlgmr.msra.gmra.mrb[10].mxu1 %vm592_vm5, %v4776_v50 }
0x16a7   : > { %4110 = vmatpush3.bf16.msra.mxu1 %v4601_v10  ;;  %3896 = vmatprep.mubr.msk.f32.mxu1 %vm4424_vm0, %v4425_v2 }
0x16a8   : > { %4111 = vmatprep.subr.bf16.mxu1 %v4423_v1 }
0x16ab   : > { %4113 = vmatpush3.bf16.msra.mxu1 %v4615_v15 }
0x16ac   : > { %4114 = vmatprep.subr.bf16.mxu1 %v4423_v1 }
0x16ae   : > { %3897 = vmatmul.mubr.msk.f32.vlgmr.msra.gmra.mrb[12].mxu1 %vm592_vm5, %v1909_v46 }
0x16af   : > { %4116 = vmatpush3.bf16.msra.mxu1 %v4689_v51  ;;  %3907 = vmatprep.mubr.msk.f32.mxu1 %vm4424_vm0, %v4425_v2 }
0x16b0   : > { %4117 = vmatprep.subr.bf16.mxu1 %v4423_v1 }
0x16b3   : > { %4119 = vmatpush3.bf16.msra.mxu1 %v4695_v53 }
0x16b4   : > { %3921 = vmatprep.subr.mxu1 %v4425_v2 }
0x1779   : > { %v4948_v6 = vpop.f32.mrb[10].mxu1 }
0x177a   : > { %v3887_v7 = vpop.f32.mrb[11].mxu1 }
0x1781   : > { %v2227_v8 = vpop.f32.mrb[12].mxu1 }
0x1782   : > { %v2231_v9 = vadd.f32 %v4654_v27, %v2227_v8  ;;  %v3898_v11 = vpop.f32.mrb[13].mxu1 }
0x1784   : > { %v2232_v12 = vmul.f32 %v2231_v9, %v4662_v32 }
0x1786   : > { %4296 = vtanh.f32 %v2232_v12 }
0x1790   : > { %v4297_v13 = vpop.eup %4296 }
0x1791   : > { %v2234_v14 = vmul.f32 %v4297_v13, %v4662_v32 }
0x1793   : > { %v2235_v17 = vadd.f32 %v2234_v14, %v4665_v38 }
0x1795   : > { %2238 = vrot.lane.b32.xlu1 %v2235_v17, %s4428_s30  ;;  %v2236_v26 = vmul.f32 %v2235_v17, %v4899_v24 }
0x1807   : > { %v2239_v18 = vpop.permute.xlu1 %2238 }
0x1808   : > { %v2241_v21 = vmul.f32 %v2239_v18, %v2235_v17 }
0x180a   : > { %2243 = vrot.lane.b32.xlu0 %v2241_v21, %s4429_s11 }
0x180e   : > { %2329 = vrot.lane.b32.xlu0 %v2078_v3, %s4429_s11 }
0x187c   : > { %v2244_v27 = vpop.permute.xlu0 %2243 }
0x187d   : > { %v2246_v31 = vadd.f32 %v2244_v27, %v2236_v26 }
0x187f   : > { %4298 = vtanh.f32 %v2246_v31 }
0x1880   : > { %v2330_v33 = vpop.permute.xlu0 %2329 }
0x1881   : > { %3919 = vmatmul.mubr.msk.f32.vlgmr.msra.gmra.mrb[22].mxu0 %vm592_vm5, %v2330_v33 }
0x1882   : > { %4128 = vmatpush3.bf16.msra.mxu0 %v4601_v10  ;;  %3934 = vmatprep.mubr.msk.f32.mxu0 %vm4424_vm0, %v4425_v2 }
0x1883   : > { %4129 = vmatprep.subr.bf16.mxu0 %v4423_v1 }
0x1886   : > { %4131 = vmatpush3.bf16.msra.mxu0 %v4615_v15 }
0x1887   : > { %3959 = vmatprep.subr.mxu0 %v4425_v2 }
0x1889   : > { %v4299_v34 = vpop.eup %4298 }
0x188a   : > { %2249 = vrot.lane.b32.xlu1 %v4299_v34, %s4428_s30 }
0x18fc   : > { %v2250_v35 = vpop.permute.xlu1 %2249 }
0x18fd   : > { %v2252_v36 = vmul.f32 %v2250_v35, %v2235_v17 }
0x18ff   : > { %2254 = vrot.lane.b32.xlu1 %v2252_v36, %s4429_s11 }
0x1954   : > { %v2399_v37 = vpop.f32.mrb[22].mxu0 }
0x1955   : > { %v4172_v39 = vadd.f32 %v4759_v22, %v2399_v37  ;;  %v3920_v40 = vpop.f32.mrb[23].mxu0 }
0x1957   : > { %v2404_v41 = vmul.f32 %v4172_v39, %v4662_v32 }
0x1959   : > { %4300 = vtanh.f32 %v2404_v41 }
0x1963   : > { %v4301_v42 = vpop.eup %4300 }
0x1964   : > { %v2406_v24 = vmul.f32 %v4301_v42, %v4662_v32 }
0x1966   : > { %v2407_v28 = vadd.f32 %v2406_v24, %v4665_v38 }
0x1968   : > { %2410 = vrot.lane.b32.xlu0 %v2407_v28, %s4428_s30  ;;  %v2408_v54 = vmul.f32 %v2407_v28, %v4926_v63 }
0x1971   : > { %v2255_v43 = vpop.permute.xlu1 %2254 }
0x1972   : > { %3908 = vmatmul.mubr.msk.f32.vlgmr.msra.gmra.mrb[14].mxu1 %vm592_vm5, %v2255_v43  ;;  %3935 = vmatmul.mubr.msk.f32.vlgmr.msra.gmra.mrb[24].mxu0 %vm592_vm5, %v2255_v43 }
0x1973   : > { %3923 = vmatprep.mubr.msk.f32.mxu1 %vm4424_vm0, %v4425_v2  ;;  %3961 = vmatprep.mubr.msk.f32.mxu0 %vm4424_vm0, %v4425_v2 }
0x19da   : > { %v2411_v45 = vpop.permute.xlu0 %2410 }
0x19db   : > { %v2413_v46 = vmul.f32 %v2411_v45, %v2407_v28 }
0x19dd   : > { %2415 = vrot.lane.b32.xlu0 %v2413_v46, %s4429_s11 }
0x1a45   : > { %v2573_v44 = vpop.f32.mrb[24].mxu0 }
0x1a46   : > { %v2577_v47 = vadd.f32 %v2573_v44, %v4660_v30  ;;  %v3936_v48 = vpop.f32.mrb[25].mxu0 }
0x1a48   : > { %v2578_v49 = vmul.f32 %v2577_v47, %v4662_v32 }
0x1a4a   : > { %4302 = vtanh.f32 %v2578_v49 }
0x1a4f   : > { %v2416_v55 = vpop.permute.xlu0 %2415 }
0x1a50   : > { %v2418_v56 = vadd.f32 %v2416_v55, %v2408_v54 }
0x1a52   : > { %4304 = vtanh.f32 %v2418_v56 }
0x1a54   : > { %v4303_v57 = vpop.eup %4302 }
0x1a55   : > { %v2580_v59 = vmul.f32 %v4303_v57, %v4662_v32 }
0x1a57   : > { %v2581_v60 = vadd.f32 %v2580_v59, %v4665_v38 }
0x1a59   : > { %2584 = vrot.lane.b32.xlu1 %v2581_v60, %s4428_s30  ;;  %v2582_v3 = vmul.f32 %v2581_v60, %v2246_v31 }
0x1a5c   : > { %v4305_v61 = vpop.eup %4304 }
0x1a5d   : > { %2421 = vrot.lane.b32.xlu0 %v4305_v61, %s4428_s30 }
0x1acb   : > { %v2585_v30 = vpop.permute.xlu1 %2584 }
0x1acc   : > { %v2587_v62 = vmul.f32 %v2585_v30, %v2581_v60 }
0x1ace   : > { %2589 = vrot.lane.b32.xlu1 %v2587_v62, %s4429_s11 }
0x1acf   : > { %v2422_v0 = vpop.permute.xlu0 %2421 }
0x1ad0   : > { %v2424_v25 = vmul.f32 %v2422_v0, %v2407_v28 }
0x1ad2   : > { %v2425_v63 = vmax.f32 %v2424_v25, 0.0 }
0x1ad4   : > { %2427 = vrot.lane.b32.xlu0 %v2425_v63, %s4429_s11 }
0x1ad8   : > { %2675 = vrot.lane.b32.xlu0 %v2424_v25, %s4429_s11 }
0x1b40   : > { %v2590_v4 = vpop.permute.xlu1 %2589 }
0x1b41   : > { %v4989_v5 = vadd.f32 %v2590_v4, %v2582_v3 }
0x1b43   : > { %4306 = vtanh.f32 %v4989_v5 }
0x1b46   : > { %v2428_v7 = vpop.permute.xlu0 %2427 }
0x1b47   : > { %3922 = vmatpush3.xpose.msk.msra.mxu1 %vm592_vm5, %v2428_v7 }
0x1b48   : > { %4132 = vmatprep.subr.bf16.mxu1 %v4423_v1 }
0x1b4a   : > { %3924 = vmatmul.mubr.msk.f32.vlgmr.msra.gmra.mrb[16].mxu1 %vm592_vm5, %v4776_v50  ;;  %v2676_v17 = vpop.permute.xlu0 %2675 }
0x1b4b   : > { %4134 = vmatpush3.bf16.msra.mxu1 %v4689_v51  ;;  %3945 = vmatprep.mubr.msk.f32.mxu1 %vm4424_vm0, %v4425_v2 }
0x1b4c   : > { %4135 = vmatprep.subr.bf16.mxu1 %v4423_v1 }
0x1b4d   : > { %v4307_v8 = vpop.eup %4306 }
0x1b4e   : > { %2595 = vrot.lane.b32.xlu1 %v4307_v8, %s4428_s30 }
0x1b4f   : > { %4137 = vmatpush3.bf16.msra.mxu1 %v4695_v53 }
0x1b50   : > { %4138 = vmatprep.subr.bf16.mxu1 %v4423_v1 }
0x1bc0   : > { %v2596_v9 = vpop.permute.xlu1 %2595 }
0x1bc1   : > { %v2598_v11 = vmul.f32 %v2596_v9, %v2581_v60 }
0x1bc3   : > { %2600 = vrot.lane.b32.xlu1 %v2598_v11, %s4429_s11 }
0x1c1d   : > { %v5004_v12 = vpop.f32.mrb[16].mxu1 }
0x1c1e   : > { %v3925_v13 = vpop.f32.mrb[17].mxu1 }
0x1c35   : > { %v2601_v14 = vpop.permute.xlu1 %2600 }
0x1c36   : > { %3946 = vmatmul.mubr.msk.f32.vlgmr.msra.gmra.mrb[18].mxu1 %vm592_vm5, %v2601_v14 }
0x1c37   : > { %4140 = vmatpush3.bf16.msra.mxu1 %v4731_v16  ;;  %3956 = vmatprep.mubr.msk.f32.mxu1 %vm4424_vm0, %v4425_v2 }
0x1c38   : > { %4141 = vmatprep.subr.bf16.mxu1 %v4423_v1 }
0x1c3b   : > { %4143 = vmatpush3.bf16.msra.mxu1 %v4741_v20 }
0x1c3c   : > { %4150 = vmatprep.subr.bf16.mxu1 %v4423_v1 }
0x1c3e   : > { %3957 = vmatmul.mubr.msk.f32.vlgmr.msra.gmra.mrb[14].mxu1 %vm592_vm5, %v2676_v17 }
0x1c3f   : > { %4152 = vmatpush3.bf16.msra.mxu1 %v4689_v51  ;;  %3983 = vmatprep.mubr.msk.f32.mxu1 %vm4424_vm0, %v4425_v2 }
0x1c40   : > { %4153 = vmatprep.subr.bf16.mxu1 %v4423_v1 }
0x1c43   : > { %4155 = vmatpush3.bf16.msra.mxu1 %v4695_v53 }
0x1c44   : > { %4156 = vmatprep.subr.bf16.mxu1 %v4423_v1 }
0x1d11   : > { %v2745_v18 = vpop.f32.mrb[14].mxu1 }
0x1d12   : > { %v4173_v21 = vadd.f32 %v4759_v22, %v2745_v18  ;;  %v3958_v26 = vpop.f32.mrb[15].mxu1 }
0x1d14   : > { %v2750_v27 = vmul.f32 %v4173_v21, %v4662_v32 }
0x1d16   : > { %4308 = vtanh.f32 %v2750_v27  ;;  %v4430_v27 = vmov 0  }
0x1d17   : > { %4258 = vset.pattern.permute.xlu1 %v4430_v27  ;;  %4259 = vset.pattern.permute.xlu0 %v4430_v27 }
0x1d20   : > { %v4309_v31 = vpop.eup %4308 }
0x1d21   : > { %v2752_v33 = vmul.f32 %v4309_v31, %v4662_v32 }
0x1d23   : > { %v2753_v51 = vadd.f32 %v2752_v33, %v4665_v38 }
0x1d25   : > { %2756 = vrot.lane.b32.xlu1 %v2753_v51, %s4428_s30  ;;  %v2754_v53 = vmul.f32 %v2753_v51, %v2418_v56 }
0x1d97   : > { %v2757_v34 = vpop.permute.xlu1 %2756 }
0x1d98   : > { %v2759_v35 = vmul.f32 %v2757_v34, %v2753_v51 }
0x1d9a   : > { %2761 = vrot.lane.b32.xlu0 %v2759_v35, %s4429_s11 }
0x1e0c   : > { %v2762_v36 = vpop.permute.xlu0 %2761 }
0x1e0d   : > { %v5026_v37 = vadd.f32 %v2762_v36, %v2754_v53 }
0x1e0f   : > { %4310 = vtanh.f32 %v5026_v37 }
0x1e19   : > { %v4311_v39 = vpop.eup %4310 }
0x1e1a   : > { %2767 = vrot.lane.b32.xlu1 %v4311_v39, %s4428_s30 }
0x1e8c   : > { %v2768_v40 = vpop.permute.xlu1 %2767 }
0x1e8d   : > { %v2770_v41 = vmul.f32 %v2768_v40, %v2753_v51 }
0x1e8f   : > { %v2771_v42 = vmax.f32 %v2770_v41, 0.0 }
0x1e91   : > { %2773 = vrot.lane.b32.xlu0 %v2771_v42, %s4429_s11 }
0x1f03   : > { %v2774_v24 = vpop.permute.xlu0 %2773 }
0x1f04   : > { %3960 = vmatpush3.xpose.msk.msra.mxu0 %vm592_vm5, %v2774_v24 }
0x1f05   : > { %4144 = vmatprep.subr.bf16.mxu0 %v4423_v1 }
0x1f07   : > { %3962 = vmatmul.mubr.msk.f32.vlgmr.msra.gmra.mrb[26].mxu0 %vm592_vm5, %v4776_v50 }
0x1f08   : > { %4146 = vmatpush3.bf16.msra.mxu0 %v4601_v10  ;;  %3972 = vmatprep.mubr.msk.f32.mxu0 %vm4424_vm0, %v4425_v2 }
0x1f09   : > { %4147 = vmatprep.subr.bf16.mxu0 %v4423_v1 }
0x1f0c   : > { %4149 = vmatpush3.bf16.msra.mxu0 %v4615_v15 }
0x1f0d   : > { %3997 = vmatprep.subr.mxu0 %v4425_v2 }
0x1f0f   : > { %3973 = vmatmul.mubr.msk.f32.vlgmr.msra.gmra.mrb[28].mxu0 %vm592_vm5, %v2601_v14 }
0x1f10   : > { %3999 = vmatprep.mubr.msk.f32.mxu0 %vm4424_vm0, %v4425_v2 }
0x1fda   : > { %v5044_v28 = vpop.f32.mrb[26].mxu0 }
0x1fdb   : > { %v3963_v43 = vpop.f32.mrb[27].mxu0 }
0x1fe2   : > { %v2919_v45 = vpop.f32.mrb[28].mxu0 }
0x1fe3   : > { %v2923_v10 = vadd.f32 %v4658_v29, %v2919_v45  ;;  %v3974_v46 = vpop.f32.mrb[29].mxu0 }
0x1fe5   : > { %v2924_v44 = vmul.f32 %v2923_v10, %v4662_v32 }
0x1fe7   : > { %4312 = vtanh.f32 %v2924_v44 }
0x1ff1   : > { %v4313_v47 = vpop.eup %4312 }
0x1ff2   : > { %v2926_v15 = vmul.f32 %v4313_v47, %v4662_v32 }
0x1ff4   : > { %v2927_v48 = vadd.f32 %v2926_v15, %v4665_v38 }
0x1ff6   : > { %2930 = vrot.lane.b32.xlu1 %v2927_v48, %s4428_s30  ;;  %v2928_v55 = vmul.f32 %v2927_v48, %v4989_v5 }
0x2068   : > { %v2931_v49 = vpop.permute.xlu1 %2930 }
0x2069   : > { %v2933_v54 = vmul.f32 %v2931_v49, %v2927_v48 }
0x206b   : > { %2935 = vrot.lane.b32.xlu0 %v2933_v54, %s4429_s11 }
0x20dd   : > { %v2936_v56 = vpop.permute.xlu0 %2935 }
0x20de   : > { %v2938_v57 = vadd.f32 %v2936_v56, %v2928_v55 }
0x20e0   : > { %4314 = vtanh.f32 %v2938_v57 }
0x20ea   : > { %v4315_v29 = vpop.eup %4314 }
0x20eb   : > { %2941 = vrot.lane.b32.xlu1 %v4315_v29, %s4428_s30 }
0x20ef   : > { %3021 = vrot.lane.b32.xlu1 %v2770_v41, %s4429_s11 }
0x215d   : > { %v2942_v59 = vpop.permute.xlu1 %2941 }
0x215e   : > { %v2944_v60 = vmul.f32 %v2942_v59, %v2927_v48 }
0x2160   : > { %2946 = vrot.lane.b32.xlu0 %v2944_v60, %s4429_s11 }
0x2161   : > { %v3022_v30 = vpop.permute.xlu1 %3021 }
0x21d2   : > { %v2947_v61 = vpop.permute.xlu0 %2946 }
0x21d3   : > { %3984 = vmatmul.mubr.msk.f32.vlgmr.msra.gmra.mrb[20].mxu1 %vm592_vm5, %v2947_v61 }
0x21d4   : > { %4158 = vmatpush3.bf16.msra.mxu1 %v4731_v16  ;;  %3994 = vmatprep.mubr.msk.f32.mxu1 %vm4424_vm0, %v4425_v2 }
0x21d5   : > { %4159 = vmatprep.subr.bf16.mxu1 %v4423_v1 }
0x21d8   : > { %4161 = vmatpush3.bf16.msra.mxu1 %v4741_v20 }
0x21d9   : > { %4162 = vmatprep.subr.bf16.mxu1 %v4423_v1 }
0x21db   : > { %3995 = vmatmul.mubr.msk.f32.vlgmr.msra.gmra.mrb[18].mxu1 %vm592_vm5, %v3022_v30 }
0x21dc   : > { %4164 = vmatpush3.bf16.msra.mxu1 %v4731_v16  ;;  %4010 = vmatprep.mubr.msk.f32.mxu1 %vm4424_vm0, %v4425_v2 }
0x21dd   : > { %4165 = vmatprep.subr.bf16.mxu1 %v4423_v1 }
0x21e0   : > { %4167 = vmatpush3.bf16.msra.mxu1 %v4741_v20 }
0x22ae   : > { %v3091_v62 = vpop.f32.mrb[18].mxu1 }
0x22af   : > { %v4174_v0 = vadd.f32 %v4759_v22, %v3091_v62  ;;  %v3996_v25 = vpop.f32.mrb[19].mxu1 }
0x22b1   : > { %v3096_v63 = vmul.f32 %v4174_v0, %v4662_v32 }
0x22b3   : > { %4316 = vtanh.f32 %v3096_v63 }
0x22bd   : > { %v4317_v3 = vpop.eup %4316 }
0x22be   : > { %v3098_v4 = vmul.f32 %v4317_v3, %v4662_v32 }
0x22c0   : > { %v3099_v5 = vadd.f32 %v3098_v4, %v4665_v38 }
0x22c2   : > { %3102 = vrot.lane.b32.xlu0 %v3099_v5, %s4428_s30  ;;  %v3100_v1 = vmul.f32 %v3099_v5, %v5026_v37 }
0x2334   : > { %v3103_v16 = vpop.permute.xlu0 %3102 }
0x2335   : > { %v3105_v7 = vmul.f32 %v3103_v16, %v3099_v5 }
0x2337   : > { %3107 = vrot.lane.b32.xlu1 %v3105_v7, %s4429_s11 }
0x23a9   : > { %v3108_v20 = vpop.permute.xlu1 %3107 }
0x23aa   : > { %v3110_v8 = vadd.f32 %v3108_v20, %v3100_v1 }
0x23ac   : > { %4318 = vtanh.f32 %v3110_v8 }
0x23b6   : > { %v4319_v9 = vpop.eup %4318 }
0x23b7   : > { %3113 = vrot.lane.b32.xlu0 %v4319_v9, %s4428_s30 }
0x2429   : > { %v3114_v11 = vpop.permute.xlu0 %3113 }
0x242a   : > { %v3116_v13 = vmul.f32 %v3114_v11, %v3099_v5 }
0x242c   : > { %3200 = vrot.lane.b32.xlu1 %v3116_v13, %s4429_s11  ;;  %v3117_v53 = vmax.f32 %v3116_v13, 0.0 }
0x249e   : > { %v3201_v14 = vpop.permute.xlu1 %3200 }
0x249f   : > { %4011 = vmatmul.mubr.msk.f32.vlgmr.msra.gmra.mrb[20].mxu1 %vm592_vm5, %v3201_v14 }
0x2572   : > { %v3270_v17 = vpop.f32.mrb[20].mxu1 }
0x2573   : > { %v4175_v18 = vadd.f32 %v4759_v22, %v3270_v17  ;;  %v4012_v21 = vpop.f32.mrb[21].mxu1  ;;  %v585_v22 = vld [vmem:[#allocation2] sm:$0x1] }
0x2575   : > { %v3275_v26 = vmul.f32 %v4175_v18, %v4662_v32 }
0x2577   : > { %4320 = vtanh.f32 %v3275_v26 }
0x2581   : > { %v4321_v31 = vpop.eup %4320 }
0x2582   : > { %v3277_v33 = vmul.f32 %v4321_v31, %v4662_v32 }
0x2584   : > { %v3278_v51 = vadd.f32 %v3277_v33, %v4665_v38  ;;  %v1040_v38 = vshrl.u32 %v414_v23, 7 }
0x2586   : > { %3281 = vrot.lane.b32.xlu0 %v3278_v51, %s4428_s30  ;;  %v3279_v36 = vmul.f32 %v3278_v51, %v3110_v8  ;;  %v1041_v41 = vsub.s32 0, %v1040_v38 }
0x25f8   : > { %v3282_v34 = vpop.permute.xlu0 %3281 }
0x25f9   : > { %v3284_v35 = vmul.f32 %v3282_v34, %v3278_v51 }
0x25fb   : > { %3286 = vrot.lane.b32.xlu1 %v3284_v35, %s4429_s11 }
0x25ff   : > { %3119 = vrot.lane.b32.xlu1 %v3117_v53, %s4429_s11 }
0x2603   : > { %1036 = vperm.xlu1 %4258, %v585_v22  }
0x266d   : > { %v3287_v37 = vpop.permute.xlu1 %3286 }
0x266e   : > { %v3289_v39 = vadd.f32 %v3287_v37, %v3279_v36 }
0x2670   : > { %4322 = vtanh.f32 %v3289_v39 }
0x2671   : > { %v3120_v40 = vpop.permute.xlu1 %3119 }
0x2672   : > { %3998 = vmatpush3.xpose.msk.msra.mxu0 %vm592_vm5, %v3120_v40 }
0x2673   : > { %4013 = vmatprep.subr.mxu0 %v4425_v2 }
0x2675   : > { %4000 = vmatmul.mubr.msk.f32.vlgmr.msra.gmra.mrb[30].mxu0 %vm592_vm5, %v4776_v50 }
0x2676   : > { %4015 = vmatprep.mubr.msk.f32.mxu0 %vm4424_vm0, %v4425_v2  ;;  %vm3376_vm0 = vcmask 516544  }
0x267a   : > { %v4323_v32 = vpop.eup %4322 }
0x267b   : > { %3292 = vrot.lane.b32.xlu0 %v4323_v32, %s4428_s30  ;;  %s4432_s30 = smov 8  }
0x2682   : > { %v1037_v42 = vpop.permute.xlu1 %1036 }
0x2683   : > { %v1042_v24 = vrot.slane %v1037_v42, %v1041_v41 }
0x2685   : > { %v1806_v43 = vadd.f32 %v4890_v19, %v1042_v24  ;;  %v1118_v45 = vadd.f32 %v4794_v52, %v1042_v24  ;;  %v2498_v2 = vadd.f32 %v5004_v12, %v1042_v24  ;;  %v1460_v19 = vadd.f32 %v4850_v58, %v1042_v24 }
0x2686   : > { %v2152_v52 = vadd.f32 %v4948_v6, %v1042_v24  ;;  %v2844_v44 = vadd.f32 %v5044_v28, %v1042_v24 }
0x2687   : > { %1810 = vrot.lane.b32.xlu1 %v1806_v43, %s4431_s28  ;;  %1122 = vst.msk [vmem:[%s5099_s29] sm:$0x1] %vm1121_vm9, %v1118_v45  ;;  %s5122_s28 = scalar_lea.hbm %s5177_s10, %s3546_s27 }
0x268b   : > { %2502 = vrot.lane.b32.xlu1 %v2498_v2, %s4429_s11 }
0x26ed   : > { %v3293_v23 = vpop.permute.xlu0 %3292 }
0x26ee   : > { %v3295_v10 = vmul.f32 %v3293_v23, %v3278_v51 }
0x26f0   : > { %v3296_v46 = vmax.f32 %v3295_v10, 0.0 }
0x26f2   : > { %3298 = vrot.lane.b32.xlu0 %v3296_v46, %s4429_s11  ;;  %s4436_s11 = smov 56  }
0x26f6   : > { %1464 = vrot.lane.b32.xlu0 %v1460_v19, %s4432_s30  ;;  %s3379_s30 = scalar_lea.sflag [#allocation5], %s397_s26 }
0x26f9   : > { %v1811_v6 = vpop.permute.xlu1 %1810 }
0x26fa   : > { %2156 = vrot.lane.b32.xlu0 %v2152_v52, %s4433_s19  ;;  %s4352_s19 = scalar_lea.vmem %s5124_s12, 16 }
0x26fb   : > { %p4353_p6 = scmp.ne.s32.totalorder %s5124_s12, %s4352_s19 }
0x26fd   : > { %v2503_v49 = vpop.permute.xlu1 %2502  ;;  %p4354_p10 = pnand %p4353_p6, %p5188_p9 }
0x26fe   : > { %2848 = vrot.lane.b32.xlu0 %v2844_v44, %s4434_s14  ;;  %s4356_s14 = sshll.u32 %s4437_s9, 4  ;;  %s4357_s14 = int_to_ptr.vmem [resolvable:$false] %s4356_s14 }
0x26ff   : > { %p4355_p12 = pneg %p4354_p10  ;;  %p4359_p2 = scmp.lt.s32.totalorder %s5124_s12, %s4357_s14 }
0x2748   : > { %v3189_v12 = vpop.f32.mrb[30].mxu0 }
0x2749   : > { %v3190_v47 = vadd.f32 %v3189_v12, %v1042_v24  ;;  %v4001_v15 = vpop.f32.mrb[31].mxu0 }
0x274b   : > { %3194 = vrot.lane.b32.xlu1 %v3190_v47, %s4435_s22  ;;  %s4358_s22 = scalar_lea.vmem %s4357_s14, 32 }
0x274c   : > { %p4360_p3 = scmp.lt.s32.totalorder %s4358_s22, %s4352_s19 }
0x274e   : > { %p4361_p4 = por %p4360_p3, %p4359_p2 }
0x2750   : > { %p4362_p7 = pnand %p4361_p4, %p4355_p12 }
0x2764   : > { %v3299_v58 = vpop.permute.xlu0 %3298 }
0x2765   : > { %4014 = vmatpush3.xpose.msk.msra.mxu0 %vm592_vm5, %v3299_v58 }
0x2768   : > { %4016 = vmatmul.mubr.msk.f32.vlgmr.msra.gmra.mrb[32].mxu0 %vm592_vm5, %v4776_v50  ;;  %v1465_v28 = vpop.permute.xlu0 %1464 }
0x2769   : > { %1468 = vst.msk [vmem:[%s5099_s29] sm:$0x1] %vm1467_vm10, %v1465_v28 }
0x276a   : > { %1814 = vst.msk [vmem:[%s5099_s29] sm:$0x1] %vm1813_vm11, %v1811_v6 }
0x276c   : > { %v2157_v48 = vpop.permute.xlu0 %2156 }
0x276d   : > { %2160 = vst.msk [vmem:[%s5099_s29] sm:$0x1] %vm2159_vm12, %v2157_v48 }
0x276e   : > { %2506 = vst.msk [vmem:[%s5099_s29] sm:$0x1] %vm2505_vm13, %v2503_v49 }
0x2770   : > { %v2849_v54 = vpop.permute.xlu0 %2848 }
0x2771   : > { %2852 = vst.msk [vmem:[%s5099_s29] sm:$0x1] %vm2851_vm14, %v2849_v54 }
0x27bd   : > { %v3195_v55 = vpop.permute.xlu1 %3194 }
0x27be   : > { %3198 = vst.msk [vmem:[%s5099_s29] sm:$0x1] %vm3197_vm15, %v3195_v55 }
0x283b   : > { %v3368_v50 = vpop.f32.mrb[32].mxu0 }
0x283c   : > { %v3369_v56 = vadd.f32 %v3368_v50, %v1042_v24  ;;  %v4017_v57 = vpop.f32.mrb[33].mxu0 }
0x283e   : > { %3373 = vrot.lane.b32.xlu0 %v3369_v56, %s4436_s11 }
0x28b0   : > { %v3374_v29 = vpop.permute.xlu0 %3373 }
0x28b1   : > { %3377 = vst.msk [vmem:[%s5099_s29] sm:$0x1] %vm3376_vm0, %v3374_v29 }
0x28b2   : > { %4365 = shalt.err (!%p4362_p7)
}
0x28b3   : > { %s4366_s26 = scalar_lea.hbm %s5122_s28, 16  ;;  %s4370_s27 = scalar_lea.hbm %s5177_s10, 32 }
0x28b4   : > { %p4367_p8 = scmp.ne.s32.totalorder %s5122_s28, %s4366_s26  ;;  %p4371_p1 = scmp.lt.u32.totalorder %s5122_s28, %s5177_s10 }
0x28b5   : > { %p4372_p0 = scmp.lt.u32.totalorder %s4370_s27, %s4366_s26  ;;  %p4374_p6 = scmp.lt.u32.totalorder %s4366_s26, %s5122_s28 }
0x28b6   : > { %p4368_p11 = pnand %p4367_p8, %p5188_p9 }
0x28b7   : > { %p4373_p5 = por %p4372_p0, %p4371_p1 }
0x28b8   : > { %p4369_p13 = pneg %p4368_p11 }
0x28b9   : > { %p4375_p10 = por %p4374_p6, %p4373_p5 }
0x28bb   : > { %p4376_p12 = pnand %p4375_p10, %p4369_p13 }
0x28bd   : > { %4379 = shalt.err (!%p4376_p12)
}
0x28be   : > { %4196 = dma.vmem_to_hbm [thread:$0]  (%p5188_p9), %s5124_s12, 16, %s5122_s28, %s3379_s30  }
0x28bf PF: > { %p4208_p2 = scmp.ge.s32.totalorder %s4418_s18, 2  ;;  %s3403_s19 = sand.u32 1, %s4406_s15  }
0x28c0   : > { %p5189_p3 = scmp.ne.s32.totalorder %s5182_s25, 0  ;;  %s3404_s9 = scalar_lea.sflag [#allocation5], %s3403_s19 }
0x28c2   : > { %p4203_p4 = pnand %p4208_p2, %p5189_p3 }
0x28c4   : > { %4401 = dma.done.wait (!%p4203_p4), %s3404_s9, 16  }
0x28c5   : > { %4403 = vsyncadd (!%p4203_p4), %s3404_s9, 4294967280  ;;  %p23_p7 = scmp.ge.s32.totalorder %s4521_s20, 4   ;;  %s5190_s15 = smov %s4410_s16 }
0x28c6   : > { %s5191_s16 = smov %s4414_s17  ;;  %s5192_s17 = smov %s4532_s23 }
0x28c7   : > { %s5193_s18 = smov %s4521_s20  ;;  %25 = sbr.rel (!%p23_p7) target bundleno = 7 (0x7), region = 108 }
0x28ce   :  { %3408 = vsyncpa [#allocation4], 1 }
0x28cf   :  { %3410 = vsyncpa [#allocation4 + $0x1], 1 }
0x28d0   :  { %3411 = vsyncpa [#allocation5], 1 }
0x28d1   :  { %3413 = vsyncpa [#allocation5 + $0x1], 1 }

</bundles_post_ra>
